<compile_context>
chip_gen: v5e
topology: v5e:2x2
jax: 0.10.0
libtpu: 0.0.40
codegen_flags: <defaults>
</compile_context>

<pallas_src>
import jax
import jax.numpy as jnp
from jax import lax
from jax.experimental import pallas as pl
from jax.experimental.pallas import tpu as pltpu


def _decoder_kernel(feat_ref, we_ref, wv_ref, whcat_ref, batt_ref, watt_ref,
                    wihf_ref, wihw_ref, blstm_ref, wfc_ref, bfc_ref,
                    logits_ref, alpha_ref,
                    weg_ref, hall_ref):
    T, B, E = we_ref.shape
    _, N, D = feat_ref.shape
    H4 = wihf_ref.shape[1]
    H = H4 // 4

    feats = feat_ref[...]                                              # (B, N, D)

    # ---------------- loop-invariant (hoisted) work -----------------------------
    # Attention feature projection + bias (used every step for t >= 1).
    af = jnp.einsum('bnd,de->bne', feats, wv_ref[...],
                    preferred_element_type=jnp.float32) + batt_ref[...]  # (B, N, D)
    # Feature half of the LSTM gates (context @ W_ih_feat == alpha-weighted sum
    # of these rows, so the per-step context matmul disappears).
    feats_gate = jnp.einsum('bnd,df->bnf', feats, wihf_ref[...],
                            preferred_element_type=jnp.float32)          # (B, N, 4H)
    # Word half of the LSTM gates for ALL time steps + pre-summed biases.
    weg_ref[...] = (jnp.einsum('tbe,ef->tbf', we_ref[...], wihw_ref[...],
                               preferred_element_type=jnp.float32)
                    + blstm_ref[...])                                    # (T, B, 4H)

    whcat = whcat_ref[...]                                               # (H, 4H + D)
    watt = watt_ref[...]                                                 # (1, D)

    # Gate columns are permuted to [i, f, o, g] by the wrapper: one sigmoid pass
    # over the first 3H lanes, one tanh over the last H lanes.
    def activate(gates, c_prev):
        sig = jax.nn.sigmoid(gates[:, :3 * H])
        i_g = sig[:, :H]
        f_g = sig[:, H:2 * H]
        o_g = sig[:, 2 * H:3 * H]
        g_g = jnp.tanh(gates[:, 3 * H:])
        c_new = f_g * c_prev + i_g * g_g
        h_new = o_g * jnp.tanh(c_new)
        return h_new, c_new

    # ---------------- step 0: mean feature, no attention, h0 = 0 ----------------
    alpha_ref[0] = jnp.zeros((B, N), jnp.float32)
    # mean(feats) @ W_ih_feat == mean over N of feats_gate; h0 == 0 so no h matmul.
    gates0 = jnp.mean(feats_gate, axis=1) + weg_ref[0]                   # (B, 4H)
    h1, c1 = activate(gates0, jnp.zeros((B, H), jnp.float32))
    hall_ref[0] = h1

    # ---------------- steps 1..T-1: attention + LSTM -----------------------------
    def body(t, carry):
        h_prev, c_prev = carry
        # Single fused MXU push per step: [gates_h | attention_h projection].
        hp = jnp.dot(h_prev, whcat, preferred_element_type=jnp.float32)  # (B, 4H+D)
        ah = hp[:, H4:]                                                  # (B, D)

        full = jnp.maximum(af + ah[:, None, :], 0.0)                     # (B, N, D)
        att = jnp.sum(full * watt[None, :, :], axis=2)                   # (B, N)
        att = att - jnp.max(att, axis=1, keepdims=True)
        e = jnp.exp(att)
        alpha = e * pl.reciprocal(jnp.sum(e, axis=1, keepdims=True), approx=True)
        alpha_ref[t] = alpha

        # context @ W_ih_feat  ==  sum_n alpha[b,n] * feats_gate[b,n,:]  (VPU only)
        feat_part = jnp.sum(alpha[:, :, None] * feats_gate, axis=1)      # (B, 4H)
        gates = hp[:, :H4] + feat_part + weg_ref[t]
        h_new, c_new = activate(gates, c_prev)
        hall_ref[t] = h_new
        return h_new, c_new

    # T is small here; for long captions drop to partial unroll to avoid spills.
    lax.fori_loop(1, T, body, (h1, c1), unroll=True)

    # ---------------- fused, batched vocab projection ----------------------------
    logits_ref[...] = (jnp.einsum('tbh,hv->tbv', hall_ref[...], wfc_ref[...],
                                  preferred_element_type=jnp.float32)
                       + bfc_ref[...])


def _full_spec(shape):
    return pl.BlockSpec(shape, lambda i: (0,) * len(shape))


def _permute_gate_cols(w, H):
    # PyTorch LSTMCell gate order [i, f, g, o] -> [i, f, o, g] along last axis.
    return jnp.concatenate([w[..., :2 * H], w[..., 3 * H:4 * H], w[..., 2 * H:3 * H]],
                           axis=-1)


def decoder_forward(features, captions, params):
    """features: (B, N, D) f32, captions: (B, T) int32. Returns (predicts, alphas)."""
    B, N, D = features.shape
    T = captions.shape[1]
    E = params['embed'].shape[1]
    H = params['w_hh_t'].shape[0]
    V = params['w_fc_t'].shape[1]

    # Glue: embedding gather; nn.Dropout is identity in eval mode.
    we = jnp.take(params['embed'], captions, axis=0)                 # (B, T, E)
    we_tm = jnp.transpose(we, (1, 0, 2))                             # (T, B, E)

    # Concat-free LSTM input weights, pre-summed biases, permuted gate columns,
    # and the fused per-step RHS [W_hh | W_att_hw].
    w_ih_feat = _permute_gate_cols(params['w_ih_t'][:D], H)          # (D, 4H)
    w_ih_word = _permute_gate_cols(params['w_ih_t'][D:], H)          # (E, 4H)
    b_lstm = _permute_gate_cols(params['b_ih'] + params['b_hh'], H)  # (1, 4H)
    w_hh_perm = _permute_gate_cols(params['w_hh_t'], H)              # (H, 4H)
    whcat = jnp.concatenate([w_hh_perm, params['wh_t']], axis=1)     # (H, 4H + D)

    grid_spec = pltpu.PrefetchScalarGridSpec(
        num_scalar_prefetch=0,
        grid=(1,),                                  # single invocation; time loop in-kernel
        in_specs=[
            _full_spec((B, N, D)),                  # features (VMEM-resident)
            _full_spec((T, B, E)),                  # word embeddings (time-major)
            _full_spec((D, D)),                     # attention_vw.weight.T
            _full_spec((H, 4 * H + D)),             # [W_hh_perm | attention_hw.T]
            _full_spec((N, 1)),                     # attention_bias
            _full_spec((1, D)),                     # attention_w.weight
            _full_spec((D, 4 * H)),                 # W_ih.T feature half (perm)
            _full_spec((E, 4 * H)),                 # W_ih.T word half (perm)
            _full_spec((1, 4 * H)),                 # b_ih + b_hh (perm)
            _full_spec((H, V)),                     # fc_out.weight.T
            _full_spec((1, V)),                     # fc_out.bias
        ],
        out_specs=[
            _full_spec((T, B, V)),                  # logits (time-major)
            _full_spec((T, B, N)),                  # alphas (time-major)
        ],
        scratch_shapes=[
            pltpu.VMEM((T, B, 4 * H), jnp.float32),  # hoisted word-gate contributions
            pltpu.VMEM((T, B, H), jnp.float32),      # hidden states (never hit HBM)
        ],
    )

    logits_tm, alphas_tm = pl.pallas_call(
        _decoder_kernel,
        out_shape=(jax.ShapeDtypeStruct((T, B, V), jnp.float32),
                   jax.ShapeDtypeStruct((T, B, N), jnp.float32)),
        grid_spec=grid_spec,
        compiler_params=pltpu.CompilerParams(
            dimension_semantics=("arbitrary",)),
    )(features, we_tm,
      params['wv_t'], whcat, params['b_att'], params['w_att'],
      w_ih_feat, w_ih_word, b_lstm, params['w_fc_t'], params['b_fc'])

    predicts = jnp.transpose(logits_tm, (1, 0, 2))                   # (B, T, V)
    alphas = jnp.transpose(alphas_tm, (1, 0, 2))                     # (B, T, N)
    return predicts, alphas


def decoder_ref(features, captions, params):
    """Pure-JAX reference mirroring the PyTorch forward (eval mode)."""
    B, N, D = features.shape
    T = captions.shape[1]
    H = params['w_hh_t'].shape[0]
    we = jnp.take(params['embed'], captions, axis=0)
    h = jnp.zeros((B, H), jnp.float32)
    c = jnp.zeros((B, H), jnp.float32)
    feas = features.mean(axis=1)
    preds, alphas = [], []
    for t in range(T):
        if t != 0:
            af = features @ params['wv_t']
            ah = h @ params['wh_t']
            full = jax.nn.relu(af + ah[:, None, :] + params['b_att'][None])
            att = jnp.sum(full * params['w_att'][None], axis=2)
            alpha = jax.nn.softmax(att, axis=1)
            feas = jnp.sum(features * alpha[:, :, None], axis=1)
        else:
            alpha = jnp.zeros((B, N), jnp.float32)
        x = jnp.concatenate([feas, we[:, t, :]], axis=1)
        gates = (x @ params['w_ih_t'] + params['b_ih']
                 + h @ params['w_hh_t'] + params['b_hh'])
        i_g = jax.nn.sigmoid(gates[:, :H])
        f_g = jax.nn.sigmoid(gates[:, H:2 * H])
        g_g = jnp.tanh(gates[:, 2 * H:3 * H])
        o_g = jax.nn.sigmoid(gates[:, 3 * H:])
        c = f_g * c + i_g * g_g
        h = o_g * jnp.tanh(c)
        preds.append(h @ params['w_fc_t'] + params['b_fc'])
        alphas.append(alpha)
    return jnp.stack(preds, axis=1), jnp.stack(alphas, axis=1)


if __name__ == "__main__":
    # Small shapes consistent with the module: vis_dim=16, vis_num=8,
    # embed_dim=16, hidden_dim=32, vocab_size=32, batch=2, time_step=6.
    B, N, D, E, H, V, T = 2, 8, 16, 16, 32, 32, 6
    keys = jax.random.split(jax.random.PRNGKey(0), 16)
    s = 0.1
    params = {
        'embed':   jax.random.normal(keys[0], (V, E), jnp.float32) * s,
        'wv_t':    jax.random.normal(keys[1], (D, D), jnp.float32) * s,   # attention_vw
        'wh_t':    jax.random.normal(keys[2], (H, D), jnp.float32) * s,   # attention_hw
        'b_att':   jax.random.normal(keys[3], (N, 1), jnp.float32) * s,   # attention_bias
        'w_att':   jax.random.normal(keys[4], (1, D), jnp.float32) * s,   # attention_w
        'w_ih_t':  jax.random.normal(keys[5], (D + E, 4 * H), jnp.float32) * s,
        'b_ih':    jax.random.normal(keys[6], (1, 4 * H), jnp.float32) * s,
        'w_hh_t':  jax.random.normal(keys[7], (H, 4 * H), jnp.float32) * s,
        'b_hh':    jax.random.normal(keys[8], (1, 4 * H), jnp.float32) * s,
        'w_fc_t':  jax.random.normal(keys[9], (H, V), jnp.float32) * s,
        'b_fc':    jax.random.normal(keys[10], (1, V), jnp.float32) * s,
    }
    features = jax.random.normal(keys[11], (B, N, D), jnp.float32)
    captions = jax.random.randint(keys[12], (B, T), 0, V, dtype=jnp.int32)

    predicts, alphas = jax.jit(decoder_forward)(features, captions, params)
    jax.block_until_ready((predicts, alphas))

    ref_p, ref_a = decoder_ref(features, captions, params)
    assert predicts.shape == (B, T, V) and alphas.shape == (B, T, N)
    # Tolerances loosened slightly vs. the exact-reciprocal version because the
    # softmax denominator uses the approximate (EUP) reciprocal.
    assert jnp.allclose(predicts, ref_p, atol=2e-3, rtol=2e-3), "predicts mismatch"
    assert jnp.allclose(alphas, ref_a, atol=2e-3, rtol=2e-3), "alphas mismatch"
    print("KERNEL_OK")
</pallas_src>

<mosaic_0001>
module attributes {stable_mosaic.version = 11 : i64} {
  func.func @_decoder_kernel(%arg0: i32, %arg1: memref<2x8x16xf32, #tpu.memory_space<vmem>>, %arg2: memref<6x2x16xf32, #tpu.memory_space<vmem>>, %arg3: memref<16x16xf32, #tpu.memory_space<vmem>>, %arg4: memref<32x144xf32, #tpu.memory_space<vmem>>, %arg5: memref<8x1xf32, #tpu.memory_space<vmem>>, %arg6: memref<1x16xf32, #tpu.memory_space<vmem>>, %arg7: memref<16x128xf32, #tpu.memory_space<vmem>>, %arg8: memref<16x128xf32, #tpu.memory_space<vmem>>, %arg9: memref<1x128xf32, #tpu.memory_space<vmem>>, %arg10: memref<32x32xf32, #tpu.memory_space<vmem>>, %arg11: memref<1x32xf32, #tpu.memory_space<vmem>>, %arg12: memref<6x2x32xf32, #tpu.memory_space<vmem>>, %arg13: memref<6x2x8xf32, #tpu.memory_space<vmem>>, %arg14: memref<6x2x128xf32, #tpu.memory_space<vmem>>, %arg15: memref<6x2x32xf32, #tpu.memory_space<vmem>>) attributes {dimension_semantics = [#tpu.dimension_semantics<arbitrary>], iteration_bounds = array<i64: 1>, scalar_prefetch = 0 : i64, scratch_operands = 2 : i64, tpu.core_type = #tpu.core_type<tc>, window_params = [{pipeline_mode = #tpu.pipeline_mode<synchronous>, transform_indices = @transform_0, window_bounds = array<i64: 2, 8, 16>}, {pipeline_mode = #tpu.pipeline_mode<synchronous>, transform_indices = @transform_1, window_bounds = array<i64: 6, 2, 16>}, {pipeline_mode = #tpu.pipeline_mode<synchronous>, transform_indices = @transform_2, window_bounds = array<i64: 16, 16>}, {pipeline_mode = #tpu.pipeline_mode<synchronous>, transform_indices = @transform_3, window_bounds = array<i64: 32, 144>}, {pipeline_mode = #tpu.pipeline_mode<synchronous>, transform_indices = @transform_4, window_bounds = array<i64: 8, 1>}, {pipeline_mode = #tpu.pipeline_mode<synchronous>, transform_indices = @transform_5, window_bounds = array<i64: 1, 16>}, {pipeline_mode = #tpu.pipeline_mode<synchronous>, transform_indices = @transform_6, window_bounds = array<i64: 16, 128>}, {pipeline_mode = #tpu.pipeline_mode<synchronous>, transform_indices = @transform_7, window_bounds = array<i64: 16, 128>}, {pipeline_mode = #tpu.pipeline_mode<synchronous>, transform_indices = @transform_8, window_bounds = array<i64: 1, 128>}, {pipeline_mode = #tpu.pipeline_mode<synchronous>, transform_indices = @transform_9, window_bounds = array<i64: 32, 32>}, {pipeline_mode = #tpu.pipeline_mode<synchronous>, transform_indices = @transform_10, window_bounds = array<i64: 1, 32>}, {pipeline_mode = #tpu.pipeline_mode<synchronous>, transform_indices = @transform_11, window_bounds = array<i64: 6, 2, 32>}, {pipeline_mode = #tpu.pipeline_mode<synchronous>, transform_indices = @transform_12, window_bounds = array<i64: 6, 2, 8>}]} {
    %c0 = arith.constant 0 : index
    %c0_0 = arith.constant 0 : index
    %c0_1 = arith.constant 0 : index
    %0 = vector.load %arg1[%c0, %c0_0, %c0_1] : memref<2x8x16xf32, #tpu.memory_space<vmem>>, vector<2x8x16xf32>
    %c0_2 = arith.constant 0 : index
    %c0_3 = arith.constant 0 : index
    %1 = vector.load %arg3[%c0_2, %c0_3] : memref<16x16xf32, #tpu.memory_space<vmem>>, vector<16x16xf32>
    "tpu.trace_start"() <{level = 10 : i32, message = "bnd,de->bne"}> : () -> ()
    %cst = arith.constant dense<0.000000e+00> : vector<2x8x16xf32>
    %2 = tpu.matmul %0, %1, %cst {dimension_numbers = #tpu.dot_dimension_numbers<[2], [0], [0, 1], [1], [0, 0, 0, 1, 1, 1], [], []>} : vector<2x8x16xf32>, vector<16x16xf32>, vector<2x8x16xf32> -> vector<2x8x16xf32>
    "tpu.trace_stop"() : () -> ()
    %c0_4 = arith.constant 0 : index
    %c0_5 = arith.constant 0 : index
    %3 = vector.load %arg5[%c0_4, %c0_5] : memref<8x1xf32, #tpu.memory_space<vmem>>, vector<8x1xf32>
    %4 = vector.shape_cast %3 : vector<8x1xf32> to vector<1x8x1xf32>
    %5 = vector.broadcast %4 : vector<1x8x1xf32> to vector<2x8x16xf32>
    %6 = arith.addf %2, %5 : vector<2x8x16xf32>
    %c0_6 = arith.constant 0 : index
    %c0_7 = arith.constant 0 : index
    %7 = vector.load %arg7[%c0_6, %c0_7] : memref<16x128xf32, #tpu.memory_space<vmem>>, vector<16x128xf32>
    "tpu.trace_start"() <{level = 10 : i32, message = "bnd,df->bnf"}> : () -> ()
    %cst_8 = arith.constant dense<0.000000e+00> : vector<2x8x128xf32>
    %8 = tpu.matmul %0, %7, %cst_8 {dimension_numbers = #tpu.dot_dimension_numbers<[2], [0], [0, 1], [1], [0, 0, 0, 1, 1, 1], [], []>} : vector<2x8x16xf32>, vector<16x128xf32>, vector<2x8x128xf32> -> vector<2x8x128xf32>
    "tpu.trace_stop"() : () -> ()
    %c0_9 = arith.constant 0 : index
    %c0_10 = arith.constant 0 : index
    %c0_11 = arith.constant 0 : index
    %9 = vector.load %arg2[%c0_9, %c0_10, %c0_11] : memref<6x2x16xf32, #tpu.memory_space<vmem>>, vector<6x2x16xf32>
    %c0_12 = arith.constant 0 : index
    %c0_13 = arith.constant 0 : index
    %10 = vector.load %arg8[%c0_12, %c0_13] : memref<16x128xf32, #tpu.memory_space<vmem>>, vector<16x128xf32>
    "tpu.trace_start"() <{level = 10 : i32, message = "tbe,ef->tbf"}> : () -> ()
    %cst_14 = arith.constant dense<0.000000e+00> : vector<6x2x128xf32>
    %11 = tpu.matmul %9, %10, %cst_14 {dimension_numbers = #tpu.dot_dimension_numbers<[2], [0], [0, 1], [1], [0, 0, 0, 1, 1, 1], [], []>} : vector<6x2x16xf32>, vector<16x128xf32>, vector<6x2x128xf32> -> vector<6x2x128xf32>
    "tpu.trace_stop"() : () -> ()
    %c0_15 = arith.constant 0 : index
    %c0_16 = arith.constant 0 : index
    %12 = vector.load %arg9[%c0_15, %c0_16] : memref<1x128xf32, #tpu.memory_space<vmem>>, vector<1x128xf32>
    %13 = vector.shape_cast %12 : vector<1x128xf32> to vector<1x1x128xf32>
    %14 = vector.broadcast %13 : vector<1x1x128xf32> to vector<6x2x128xf32>
    %15 = arith.addf %11, %14 : vector<6x2x128xf32>
    %c0_17 = arith.constant 0 : index
    %c0_18 = arith.constant 0 : index
    %c0_19 = arith.constant 0 : index
    %16 = vector.load %arg14[%c0_17, %c0_18, %c0_19] : memref<6x2x128xf32, #tpu.memory_space<vmem>>, vector<6x2x128xf32>
    tpu.vector_store %arg14[%c0_17, %c0_18, %c0_19], %15 {strides = array<i32>} : memref<6x2x128xf32, #tpu.memory_space<vmem>>, vector<6x2x128xf32>,
    %c0_20 = arith.constant 0 : index
    %c0_21 = arith.constant 0 : index
    %17 = vector.load %arg4[%c0_20, %c0_21] : memref<32x144xf32, #tpu.memory_space<vmem>>, vector<32x144xf32>
    %c0_22 = arith.constant 0 : index
    %c0_23 = arith.constant 0 : index
    %18 = vector.load %arg6[%c0_22, %c0_23] : memref<1x16xf32, #tpu.memory_space<vmem>>, vector<1x16xf32>
    %cst_24 = arith.constant 0.000000e+00 : f32
    %19 = vector.broadcast %cst_24 : f32 to vector<2x8xf32>
    %c0_25 = arith.constant 0 : index
    %c0_26 = arith.constant 0 : index
    %c0_27 = arith.constant 0 : index
    %20 = vector.load %arg13[%c0_25, %c0_26, %c0_27] : memref<6x2x8xf32, #tpu.memory_space<vmem>>, vector<1x2x8xf32>
    %21 = vector.shape_cast %20 : vector<1x2x8xf32> to vector<2x8xf32>
    %22 = vector.shape_cast %19 : vector<2x8xf32> to vector<1x2x8xf32>
    tpu.vector_store %arg13[%c0_25, %c0_26, %c0_27], %22 {strides = array<i32>} : memref<6x2x8xf32, #tpu.memory_space<vmem>>, vector<1x2x8xf32>,
    %cst_28 = arith.constant dense<0.000000e+00> : vector<2x128xf32>
    %23 = vector.multi_reduction <add>, %8, %cst_28 [1] : vector<2x8x128xf32> to vector<2x128xf32>
    %cst_29 = arith.constant 8.000000e+00 : f32
    %24 = vector.broadcast %cst_29 : f32 to vector<2x128xf32>
    %25 = arith.divf %23, %24 : vector<2x128xf32>
    %c0_30 = arith.constant 0 : index
    %c0_31 = arith.constant 0 : index
    %c0_32 = arith.constant 0 : index
    %26 = vector.load %arg14[%c0_30, %c0_31, %c0_32] : memref<6x2x128xf32, #tpu.memory_space<vmem>>, vector<1x2x128xf32>
    %27 = vector.shape_cast %26 : vector<1x2x128xf32> to vector<2x128xf32>
    %28 = arith.addf %25, %27 : vector<2x128xf32>
    %cst_33 = arith.constant 0.000000e+00 : f32
    %29 = vector.broadcast %cst_33 : f32 to vector<2x32xf32>
    %30 = vector.extract_strided_slice %28 {offsets = [0, 0], sizes = [2, 96], strides = [1, 1]} : vector<2x128xf32> to vector<2x96xf32>
    %31 = arith.negf %30 : vector<2x96xf32>
    %32 = math.exp %31 : vector<2x96xf32>
    %cst_34 = arith.constant 1.000000e+00 : f32
    %33 = vector.broadcast %cst_34 : f32 to vector<2x96xf32>
    %34 = arith.addf %33, %32 : vector<2x96xf32>
    %35 = arith.divf %33, %34 : vector<2x96xf32>
    %36 = vector.extract_strided_slice %35 {offsets = [0, 0], sizes = [2, 32], strides = [1, 1]} : vector<2x96xf32> to vector<2x32xf32>
    %37 = vector.extract_strided_slice %35 {offsets = [0, 32], sizes = [2, 32], strides = [1, 1]} : vector<2x96xf32> to vector<2x32xf32>
    %38 = vector.extract_strided_slice %35 {offsets = [0, 64], sizes = [2, 32], strides = [1, 1]} : vector<2x96xf32> to vector<2x32xf32>
    %39 = vector.extract_strided_slice %28 {offsets = [0, 96], sizes = [2, 32], strides = [1, 1]} : vector<2x128xf32> to vector<2x32xf32>
    %40 = math.tanh %39 : vector<2x32xf32>
    %41 = arith.mulf %37, %29 : vector<2x32xf32>
    %42 = arith.mulf %36, %40 : vector<2x32xf32>
    %43 = arith.addf %41, %42 : vector<2x32xf32>
    %44 = math.tanh %43 : vector<2x32xf32>
    %45 = arith.mulf %38, %44 : vector<2x32xf32>
    %c0_35 = arith.constant 0 : index
    %c0_36 = arith.constant 0 : index
    %c0_37 = arith.constant 0 : index
    %46 = vector.load %arg15[%c0_35, %c0_36, %c0_37] : memref<6x2x32xf32, #tpu.memory_space<vmem>>, vector<1x2x32xf32>
    %47 = vector.shape_cast %46 : vector<1x2x32xf32> to vector<2x32xf32>
    %48 = vector.shape_cast %45 : vector<2x32xf32> to vector<1x2x32xf32>
    tpu.vector_store %arg15[%c0_35, %c0_36, %c0_37], %48 {strides = array<i32>} : memref<6x2x32xf32, #tpu.memory_space<vmem>>, vector<1x2x32xf32>,
    %c1_i32 = arith.constant 1 : i32
    %cst_38 = arith.constant dense<0.000000e+00> : vector<2x144xf32>
    %49 = tpu.matmul %45, %17, %cst_38 {dimension_numbers = #tpu.dot_dimension_numbers<[1], [0], [0], [1], [0, 0, 1, 1], [], []>} : vector<2x32xf32>, vector<32x144xf32>, vector<2x144xf32> -> vector<2x144xf32>
    %50 = vector.extract_strided_slice %49 {offsets = [0, 128], sizes = [2, 16], strides = [1, 1]} : vector<2x144xf32> to vector<2x16xf32>
    %51 = vector.shape_cast %50 : vector<2x16xf32> to vector<2x1x16xf32>
    %52 = vector.broadcast %51 : vector<2x1x16xf32> to vector<2x8x16xf32>
    %53 = arith.addf %6, %52 : vector<2x8x16xf32>
    %cst_39 = arith.constant 0.000000e+00 : f32
    %54 = vector.broadcast %cst_39 : f32 to vector<2x8x16xf32>
    %55 = arith.maximumf %53, %54 : vector<2x8x16xf32>
    %56 = vector.shape_cast %18 : vector<1x16xf32> to vector<1x1x16xf32>
    %57 = vector.broadcast %56 : vector<1x1x16xf32> to vector<2x8x16xf32>
    %58 = arith.mulf %55, %57 : vector<2x8x16xf32>
    %cst_40 = arith.constant dense<0.000000e+00> : vector<2x8xf32>
    %59 = vector.multi_reduction <add>, %58, %cst_40 [2] : vector<2x8x16xf32> to vector<2x8xf32>
    %cst_41 = arith.constant dense<0xFF800000> : vector<2xf32>
    %60 = vector.multi_reduction <maximumf>, %59, %cst_41 [1] : vector<2x8xf32> to vector<2xf32>
    %61 = vector.shape_cast %60 : vector<2xf32> to vector<2x1xf32>
    %62 = vector.broadcast %61 : vector<2x1xf32> to vector<2x8xf32>
    %63 = arith.subf %59, %62 : vector<2x8xf32>
    %64 = math.exp %63 : vector<2x8xf32>
    %cst_42 = arith.constant dense<0.000000e+00> : vector<2xf32>
    %65 = vector.multi_reduction <add>, %64, %cst_42 [1] : vector<2x8xf32> to vector<2xf32>
    %66 = vector.shape_cast %65 : vector<2xf32> to vector<2x1xf32>
    %67 = tpu.reciprocal %66 {approx = true} : vector<2x1xf32> -> vector<2x1xf32>
    %68 = vector.broadcast %67 : vector<2x1xf32> to vector<2x8xf32>
    %69 = arith.mulf %64, %68 : vector<2x8xf32>
    %70 = arith.index_cast %c1_i32 : i32 to index
    %c0_43 = arith.constant 0 : index
    %c0_44 = arith.constant 0 : index
    %71 = vector.load %arg13[%70, %c0_43, %c0_44] : memref<6x2x8xf32, #tpu.memory_space<vmem>>, vector<1x2x8xf32>
    %72 = vector.shape_cast %71 : vector<1x2x8xf32> to vector<2x8xf32>
    %73 = vector.shape_cast %69 : vector<2x8xf32> to vector<1x2x8xf32>
    tpu.vector_store %arg13[%70, %c0_43, %c0_44], %73 {strides = array<i32>} : memref<6x2x8xf32, #tpu.memory_space<vmem>>, vector<1x2x8xf32>,
    %74 = vector.shape_cast %69 : vector<2x8xf32> to vector<2x8x1xf32>
    %75 = vector.broadcast %74 : vector<2x8x1xf32> to vector<2x8x128xf32>
    %76 = arith.mulf %75, %8 : vector<2x8x128xf32>
    %cst_45 = arith.constant dense<0.000000e+00> : vector<2x128xf32>
    %77 = vector.multi_reduction <add>, %76, %cst_45 [1] : vector<2x8x128xf32> to vector<2x128xf32>
    %78 = vector.extract_strided_slice %49 {offsets = [0, 0], sizes = [2, 128], strides = [1, 1]} : vector<2x144xf32> to vector<2x128xf32>
    %79 = arith.addf %78, %77 : vector<2x128xf32>
    %80 = arith.index_cast %c1_i32 : i32 to index
    %c0_46 = arith.constant 0 : index
    %c0_47 = arith.constant 0 : index
    %81 = vector.load %arg14[%80, %c0_46, %c0_47] : memref<6x2x128xf32, #tpu.memory_space<vmem>>, vector<1x2x128xf32>
    %82 = vector.shape_cast %81 : vector<1x2x128xf32> to vector<2x128xf32>
    %83 = arith.addf %79, %82 : vector<2x128xf32>
    %84 = vector.extract_strided_slice %83 {offsets = [0, 0], sizes = [2, 96], strides = [1, 1]} : vector<2x128xf32> to vector<2x96xf32>
    %85 = arith.negf %84 : vector<2x96xf32>
    %86 = math.exp %85 : vector<2x96xf32>
    %cst_48 = arith.constant 1.000000e+00 : f32
    %87 = vector.broadcast %cst_48 : f32 to vector<2x96xf32>
    %88 = arith.addf %87, %86 : vector<2x96xf32>
    %89 = arith.divf %87, %88 : vector<2x96xf32>
    %90 = vector.extract_strided_slice %89 {offsets = [0, 0], sizes = [2, 32], strides = [1, 1]} : vector<2x96xf32> to vector<2x32xf32>
    %91 = vector.extract_strided_slice %89 {offsets = [0, 32], sizes = [2, 32], strides = [1, 1]} : vector<2x96xf32> to vector<2x32xf32>
    %92 = vector.extract_strided_slice %89 {offsets = [0, 64], sizes = [2, 32], strides = [1, 1]} : vector<2x96xf32> to vector<2x32xf32>
    %93 = vector.extract_strided_slice %83 {offsets = [0, 96], sizes = [2, 32], strides = [1, 1]} : vector<2x128xf32> to vector<2x32xf32>
    %94 = math.tanh %93 : vector<2x32xf32>
    %95 = arith.mulf %91, %43 : vector<2x32xf32>
    %96 = arith.mulf %90, %94 : vector<2x32xf32>
    %97 = arith.addf %95, %96 : vector<2x32xf32>
    %98 = math.tanh %97 : vector<2x32xf32>
    %99 = arith.mulf %92, %98 : vector<2x32xf32>
    %100 = arith.index_cast %c1_i32 : i32 to index
    %c0_49 = arith.constant 0 : index
    %c0_50 = arith.constant 0 : index
    %101 = vector.load %arg15[%100, %c0_49, %c0_50] : memref<6x2x32xf32, #tpu.memory_space<vmem>>, vector<1x2x32xf32>
    %102 = vector.shape_cast %101 : vector<1x2x32xf32> to vector<2x32xf32>
    %103 = vector.shape_cast %99 : vector<2x32xf32> to vector<1x2x32xf32>
    tpu.vector_store %arg15[%100, %c0_49, %c0_50], %103 {strides = array<i32>} : memref<6x2x32xf32, #tpu.memory_space<vmem>>, vector<1x2x32xf32>,
    %c2_i32 = arith.constant 2 : i32
    %cst_51 = arith.constant dense<0.000000e+00> : vector<2x144xf32>
    %104 = tpu.matmul %99, %17, %cst_51 {dimension_numbers = #tpu.dot_dimension_numbers<[1], [0], [0], [1], [0, 0, 1, 1], [], []>} : vector<2x32xf32>, vector<32x144xf32>, vector<2x144xf32> -> vector<2x144xf32>
    %105 = vector.extract_strided_slice %104 {offsets = [0, 128], sizes = [2, 16], strides = [1, 1]} : vector<2x144xf32> to vector<2x16xf32>
    %106 = vector.shape_cast %105 : vector<2x16xf32> to vector<2x1x16xf32>
    %107 = vector.broadcast %106 : vector<2x1x16xf32> to vector<2x8x16xf32>
    %108 = arith.addf %6, %107 : vector<2x8x16xf32>
    %cst_52 = arith.constant 0.000000e+00 : f32
    %109 = vector.broadcast %cst_52 : f32 to vector<2x8x16xf32>
    %110 = arith.maximumf %108, %109 : vector<2x8x16xf32>
    %111 = vector.shape_cast %18 : vector<1x16xf32> to vector<1x1x16xf32>
    %112 = vector.broadcast %111 : vector<1x1x16xf32> to vector<2x8x16xf32>
    %113 = arith.mulf %110, %112 : vector<2x8x16xf32>
    %cst_53 = arith.constant dense<0.000000e+00> : vector<2x8xf32>
    %114 = vector.multi_reduction <add>, %113, %cst_53 [2] : vector<2x8x16xf32> to vector<2x8xf32>
    %cst_54 = arith.constant dense<0xFF800000> : vector<2xf32>
    %115 = vector.multi_reduction <maximumf>, %114, %cst_54 [1] : vector<2x8xf32> to vector<2xf32>
    %116 = vector.shape_cast %115 : vector<2xf32> to vector<2x1xf32>
    %117 = vector.broadcast %116 : vector<2x1xf32> to vector<2x8xf32>
    %118 = arith.subf %114, %117 : vector<2x8xf32>
    %119 = math.exp %118 : vector<2x8xf32>
    %cst_55 = arith.constant dense<0.000000e+00> : vector<2xf32>
    %120 = vector.multi_reduction <add>, %119, %cst_55 [1] : vector<2x8xf32> to vector<2xf32>
    %121 = vector.shape_cast %120 : vector<2xf32> to vector<2x1xf32>
    %122 = tpu.reciprocal %121 {approx = true} : vector<2x1xf32> -> vector<2x1xf32>
    %123 = vector.broadcast %122 : vector<2x1xf32> to vector<2x8xf32>
    %124 = arith.mulf %119, %123 : vector<2x8xf32>
    %125 = arith.index_cast %c2_i32 : i32 to index
    %c0_56 = arith.constant 0 : index
    %c0_57 = arith.constant 0 : index
    %126 = vector.load %arg13[%125, %c0_56, %c0_57] : memref<6x2x8xf32, #tpu.memory_space<vmem>>, vector<1x2x8xf32>
    %127 = vector.shape_cast %126 : vector<1x2x8xf32> to vector<2x8xf32>
    %128 = vector.shape_cast %124 : vector<2x8xf32> to vector<1x2x8xf32>
    tpu.vector_store %arg13[%125, %c0_56, %c0_57], %128 {strides = array<i32>} : memref<6x2x8xf32, #tpu.memory_space<vmem>>, vector<1x2x8xf32>,
    %129 = vector.shape_cast %124 : vector<2x8xf32> to vector<2x8x1xf32>
    %130 = vector.broadcast %129 : vector<2x8x1xf32> to vector<2x8x128xf32>
    %131 = arith.mulf %130, %8 : vector<2x8x128xf32>
    %cst_58 = arith.constant dense<0.000000e+00> : vector<2x128xf32>
    %132 = vector.multi_reduction <add>, %131, %cst_58 [1] : vector<2x8x128xf32> to vector<2x128xf32>
    %133 = vector.extract_strided_slice %104 {offsets = [0, 0], sizes = [2, 128], strides = [1, 1]} : vector<2x144xf32> to vector<2x128xf32>
    %134 = arith.addf %133, %132 : vector<2x128xf32>
    %135 = arith.index_cast %c2_i32 : i32 to index
    %c0_59 = arith.constant 0 : index
    %c0_60 = arith.constant 0 : index
    %136 = vector.load %arg14[%135, %c0_59, %c0_60] : memref<6x2x128xf32, #tpu.memory_space<vmem>>, vector<1x2x128xf32>
    %137 = vector.shape_cast %136 : vector<1x2x128xf32> to vector<2x128xf32>
    %138 = arith.addf %134, %137 : vector<2x128xf32>
    %139 = vector.extract_strided_slice %138 {offsets = [0, 0], sizes = [2, 96], strides = [1, 1]} : vector<2x128xf32> to vector<2x96xf32>
    %140 = arith.negf %139 : vector<2x96xf32>
    %141 = math.exp %140 : vector<2x96xf32>
    %cst_61 = arith.constant 1.000000e+00 : f32
    %142 = vector.broadcast %cst_61 : f32 to vector<2x96xf32>
    %143 = arith.addf %142, %141 : vector<2x96xf32>
    %144 = arith.divf %142, %143 : vector<2x96xf32>
    %145 = vector.extract_strided_slice %144 {offsets = [0, 0], sizes = [2, 32], strides = [1, 1]} : vector<2x96xf32> to vector<2x32xf32>
    %146 = vector.extract_strided_slice %144 {offsets = [0, 32], sizes = [2, 32], strides = [1, 1]} : vector<2x96xf32> to vector<2x32xf32>
    %147 = vector.extract_strided_slice %144 {offsets = [0, 64], sizes = [2, 32], strides = [1, 1]} : vector<2x96xf32> to vector<2x32xf32>
    %148 = vector.extract_strided_slice %138 {offsets = [0, 96], sizes = [2, 32], strides = [1, 1]} : vector<2x128xf32> to vector<2x32xf32>
    %149 = math.tanh %148 : vector<2x32xf32>
    %150 = arith.mulf %146, %97 : vector<2x32xf32>
    %151 = arith.mulf %145, %149 : vector<2x32xf32>
    %152 = arith.addf %150, %151 : vector<2x32xf32>
    %153 = math.tanh %152 : vector<2x32xf32>
    %154 = arith.mulf %147, %153 : vector<2x32xf32>
    %155 = arith.index_cast %c2_i32 : i32 to index
    %c0_62 = arith.constant 0 : index
    %c0_63 = arith.constant 0 : index
    %156 = vector.load %arg15[%155, %c0_62, %c0_63] : memref<6x2x32xf32, #tpu.memory_space<vmem>>, vector<1x2x32xf32>
    %157 = vector.shape_cast %156 : vector<1x2x32xf32> to vector<2x32xf32>
    %158 = vector.shape_cast %154 : vector<2x32xf32> to vector<1x2x32xf32>
    tpu.vector_store %arg15[%155, %c0_62, %c0_63], %158 {strides = array<i32>} : memref<6x2x32xf32, #tpu.memory_space<vmem>>, vector<1x2x32xf32>,
    %c3_i32 = arith.constant 3 : i32
    %cst_64 = arith.constant dense<0.000000e+00> : vector<2x144xf32>
    %159 = tpu.matmul %154, %17, %cst_64 {dimension_numbers = #tpu.dot_dimension_numbers<[1], [0], [0], [1], [0, 0, 1, 1], [], []>} : vector<2x32xf32>, vector<32x144xf32>, vector<2x144xf32> -> vector<2x144xf32>
    %160 = vector.extract_strided_slice %159 {offsets = [0, 128], sizes = [2, 16], strides = [1, 1]} : vector<2x144xf32> to vector<2x16xf32>
    %161 = vector.shape_cast %160 : vector<2x16xf32> to vector<2x1x16xf32>
    %162 = vector.broadcast %161 : vector<2x1x16xf32> to vector<2x8x16xf32>
    %163 = arith.addf %6, %162 : vector<2x8x16xf32>
    %cst_65 = arith.constant 0.000000e+00 : f32
    %164 = vector.broadcast %cst_65 : f32 to vector<2x8x16xf32>
    %165 = arith.maximumf %163, %164 : vector<2x8x16xf32>
    %166 = vector.shape_cast %18 : vector<1x16xf32> to vector<1x1x16xf32>
    %167 = vector.broadcast %166 : vector<1x1x16xf32> to vector<2x8x16xf32>
    %168 = arith.mulf %165, %167 : vector<2x8x16xf32>
    %cst_66 = arith.constant dense<0.000000e+00> : vector<2x8xf32>
    %169 = vector.multi_reduction <add>, %168, %cst_66 [2] : vector<2x8x16xf32> to vector<2x8xf32>
    %cst_67 = arith.constant dense<0xFF800000> : vector<2xf32>
    %170 = vector.multi_reduction <maximumf>, %169, %cst_67 [1] : vector<2x8xf32> to vector<2xf32>
    %171 = vector.shape_cast %170 : vector<2xf32> to vector<2x1xf32>
    %172 = vector.broadcast %171 : vector<2x1xf32> to vector<2x8xf32>
    %173 = arith.subf %169, %172 : vector<2x8xf32>
    %174 = math.exp %173 : vector<2x8xf32>
    %cst_68 = arith.constant dense<0.000000e+00> : vector<2xf32>
    %175 = vector.multi_reduction <add>, %174, %cst_68 [1] : vector<2x8xf32> to vector<2xf32>
    %176 = vector.shape_cast %175 : vector<2xf32> to vector<2x1xf32>
    %177 = tpu.reciprocal %176 {approx = true} : vector<2x1xf32> -> vector<2x1xf32>
    %178 = vector.broadcast %177 : vector<2x1xf32> to vector<2x8xf32>
    %179 = arith.mulf %174, %178 : vector<2x8xf32>
    %180 = arith.index_cast %c3_i32 : i32 to index
    %c0_69 = arith.constant 0 : index
    %c0_70 = arith.constant 0 : index
    %181 = vector.load %arg13[%180, %c0_69, %c0_70] : memref<6x2x8xf32, #tpu.memory_space<vmem>>, vector<1x2x8xf32>
    %182 = vector.shape_cast %181 : vector<1x2x8xf32> to vector<2x8xf32>
    %183 = vector.shape_cast %179 : vector<2x8xf32> to vector<1x2x8xf32>
    tpu.vector_store %arg13[%180, %c0_69, %c0_70], %183 {strides = array<i32>} : memref<6x2x8xf32, #tpu.memory_space<vmem>>, vector<1x2x8xf32>,
    %184 = vector.shape_cast %179 : vector<2x8xf32> to vector<2x8x1xf32>
    %185 = vector.broadcast %184 : vector<2x8x1xf32> to vector<2x8x128xf32>
    %186 = arith.mulf %185, %8 : vector<2x8x128xf32>
    %cst_71 = arith.constant dense<0.000000e+00> : vector<2x128xf32>
    %187 = vector.multi_reduction <add>, %186, %cst_71 [1] : vector<2x8x128xf32> to vector<2x128xf32>
    %188 = vector.extract_strided_slice %159 {offsets = [0, 0], sizes = [2, 128], strides = [1, 1]} : vector<2x144xf32> to vector<2x128xf32>
    %189 = arith.addf %188, %187 : vector<2x128xf32>
    %190 = arith.index_cast %c3_i32 : i32 to index
    %c0_72 = arith.constant 0 : index
    %c0_73 = arith.constant 0 : index
    %191 = vector.load %arg14[%190, %c0_72, %c0_73] : memref<6x2x128xf32, #tpu.memory_space<vmem>>, vector<1x2x128xf32>
    %192 = vector.shape_cast %191 : vector<1x2x128xf32> to vector<2x128xf32>
    %193 = arith.addf %189, %192 : vector<2x128xf32>
    %194 = vector.extract_strided_slice %193 {offsets = [0, 0], sizes = [2, 96], strides = [1, 1]} : vector<2x128xf32> to vector<2x96xf32>
    %195 = arith.negf %194 : vector<2x96xf32>
    %196 = math.exp %195 : vector<2x96xf32>
    %cst_74 = arith.constant 1.000000e+00 : f32
    %197 = vector.broadcast %cst_74 : f32 to vector<2x96xf32>
    %198 = arith.addf %197, %196 : vector<2x96xf32>
    %199 = arith.divf %197, %198 : vector<2x96xf32>
    %200 = vector.extract_strided_slice %199 {offsets = [0, 0], sizes = [2, 32], strides = [1, 1]} : vector<2x96xf32> to vector<2x32xf32>
    %201 = vector.extract_strided_slice %199 {offsets = [0, 32], sizes = [2, 32], strides = [1, 1]} : vector<2x96xf32> to vector<2x32xf32>
    %202 = vector.extract_strided_slice %199 {offsets = [0, 64], sizes = [2, 32], strides = [1, 1]} : vector<2x96xf32> to vector<2x32xf32>
    %203 = vector.extract_strided_slice %193 {offsets = [0, 96], sizes = [2, 32], strides = [1, 1]} : vector<2x128xf32> to vector<2x32xf32>
    %204 = math.tanh %203 : vector<2x32xf32>
    %205 = arith.mulf %201, %152 : vector<2x32xf32>
    %206 = arith.mulf %200, %204 : vector<2x32xf32>
    %207 = arith.addf %205, %206 : vector<2x32xf32>
    %208 = math.tanh %207 : vector<2x32xf32>
    %209 = arith.mulf %202, %208 : vector<2x32xf32>
    %210 = arith.index_cast %c3_i32 : i32 to index
    %c0_75 = arith.constant 0 : index
    %c0_76 = arith.constant 0 : index
    %211 = vector.load %arg15[%210, %c0_75, %c0_76] : memref<6x2x32xf32, #tpu.memory_space<vmem>>, vector<1x2x32xf32>
    %212 = vector.shape_cast %211 : vector<1x2x32xf32> to vector<2x32xf32>
    %213 = vector.shape_cast %209 : vector<2x32xf32> to vector<1x2x32xf32>
    tpu.vector_store %arg15[%210, %c0_75, %c0_76], %213 {strides = array<i32>} : memref<6x2x32xf32, #tpu.memory_space<vmem>>, vector<1x2x32xf32>,
    %c4_i32 = arith.constant 4 : i32
    %cst_77 = arith.constant dense<0.000000e+00> : vector<2x144xf32>
    %214 = tpu.matmul %209, %17, %cst_77 {dimension_numbers = #tpu.dot_dimension_numbers<[1], [0], [0], [1], [0, 0, 1, 1], [], []>} : vector<2x32xf32>, vector<32x144xf32>, vector<2x144xf32> -> vector<2x144xf32>
    %215 = vector.extract_strided_slice %214 {offsets = [0, 128], sizes = [2, 16], strides = [1, 1]} : vector<2x144xf32> to vector<2x16xf32>
    %216 = vector.shape_cast %215 : vector<2x16xf32> to vector<2x1x16xf32>
    %217 = vector.broadcast %216 : vector<2x1x16xf32> to vector<2x8x16xf32>
    %218 = arith.addf %6, %217 : vector<2x8x16xf32>
    %cst_78 = arith.constant 0.000000e+00 : f32
    %219 = vector.broadcast %cst_78 : f32 to vector<2x8x16xf32>
    %220 = arith.maximumf %218, %219 : vector<2x8x16xf32>
    %221 = vector.shape_cast %18 : vector<1x16xf32> to vector<1x1x16xf32>
    %222 = vector.broadcast %221 : vector<1x1x16xf32> to vector<2x8x16xf32>
    %223 = arith.mulf %220, %222 : vector<2x8x16xf32>
    %cst_79 = arith.constant dense<0.000000e+00> : vector<2x8xf32>
    %224 = vector.multi_reduction <add>, %223, %cst_79 [2] : vector<2x8x16xf32> to vector<2x8xf32>
    %cst_80 = arith.constant dense<0xFF800000> : vector<2xf32>
    %225 = vector.multi_reduction <maximumf>, %224, %cst_80 [1] : vector<2x8xf32> to vector<2xf32>
    %226 = vector.shape_cast %225 : vector<2xf32> to vector<2x1xf32>
    %227 = vector.broadcast %226 : vector<2x1xf32> to vector<2x8xf32>
    %228 = arith.subf %224, %227 : vector<2x8xf32>
    %229 = math.exp %228 : vector<2x8xf32>
    %cst_81 = arith.constant dense<0.000000e+00> : vector<2xf32>
    %230 = vector.multi_reduction <add>, %229, %cst_81 [1] : vector<2x8xf32> to vector<2xf32>
    %231 = vector.shape_cast %230 : vector<2xf32> to vector<2x1xf32>
    %232 = tpu.reciprocal %231 {approx = true} : vector<2x1xf32> -> vector<2x1xf32>
    %233 = vector.broadcast %232 : vector<2x1xf32> to vector<2x8xf32>
    %234 = arith.mulf %229, %233 : vector<2x8xf32>
    %235 = arith.index_cast %c4_i32 : i32 to index
    %c0_82 = arith.constant 0 : index
    %c0_83 = arith.constant 0 : index
    %236 = vector.load %arg13[%235, %c0_82, %c0_83] : memref<6x2x8xf32, #tpu.memory_space<vmem>>, vector<1x2x8xf32>
    %237 = vector.shape_cast %236 : vector<1x2x8xf32> to vector<2x8xf32>
    %238 = vector.shape_cast %234 : vector<2x8xf32> to vector<1x2x8xf32>
    tpu.vector_store %arg13[%235, %c0_82, %c0_83], %238 {strides = array<i32>} : memref<6x2x8xf32, #tpu.memory_space<vmem>>, vector<1x2x8xf32>,
    %239 = vector.shape_cast %234 : vector<2x8xf32> to vector<2x8x1xf32>
    %240 = vector.broadcast %239 : vector<2x8x1xf32> to vector<2x8x128xf32>
    %241 = arith.mulf %240, %8 : vector<2x8x128xf32>
    %cst_84 = arith.constant dense<0.000000e+00> : vector<2x128xf32>
    %242 = vector.multi_reduction <add>, %241, %cst_84 [1] : vector<2x8x128xf32> to vector<2x128xf32>
    %243 = vector.extract_strided_slice %214 {offsets = [0, 0], sizes = [2, 128], strides = [1, 1]} : vector<2x144xf32> to vector<2x128xf32>
    %244 = arith.addf %243, %242 : vector<2x128xf32>
    %245 = arith.index_cast %c4_i32 : i32 to index
    %c0_85 = arith.constant 0 : index
    %c0_86 = arith.constant 0 : index
    %246 = vector.load %arg14[%245, %c0_85, %c0_86] : memref<6x2x128xf32, #tpu.memory_space<vmem>>, vector<1x2x128xf32>
    %247 = vector.shape_cast %246 : vector<1x2x128xf32> to vector<2x128xf32>
    %248 = arith.addf %244, %247 : vector<2x128xf32>
    %249 = vector.extract_strided_slice %248 {offsets = [0, 0], sizes = [2, 96], strides = [1, 1]} : vector<2x128xf32> to vector<2x96xf32>
    %250 = arith.negf %249 : vector<2x96xf32>
    %251 = math.exp %250 : vector<2x96xf32>
    %cst_87 = arith.constant 1.000000e+00 : f32
    %252 = vector.broadcast %cst_87 : f32 to vector<2x96xf32>
    %253 = arith.addf %252, %251 : vector<2x96xf32>
    %254 = arith.divf %252, %253 : vector<2x96xf32>
    %255 = vector.extract_strided_slice %254 {offsets = [0, 0], sizes = [2, 32], strides = [1, 1]} : vector<2x96xf32> to vector<2x32xf32>
    %256 = vector.extract_strided_slice %254 {offsets = [0, 32], sizes = [2, 32], strides = [1, 1]} : vector<2x96xf32> to vector<2x32xf32>
    %257 = vector.extract_strided_slice %254 {offsets = [0, 64], sizes = [2, 32], strides = [1, 1]} : vector<2x96xf32> to vector<2x32xf32>
    %258 = vector.extract_strided_slice %248 {offsets = [0, 96], sizes = [2, 32], strides = [1, 1]} : vector<2x128xf32> to vector<2x32xf32>
    %259 = math.tanh %258 : vector<2x32xf32>
    %260 = arith.mulf %256, %207 : vector<2x32xf32>
    %261 = arith.mulf %255, %259 : vector<2x32xf32>
    %262 = arith.addf %260, %261 : vector<2x32xf32>
    %263 = math.tanh %262 : vector<2x32xf32>
    %264 = arith.mulf %257, %263 : vector<2x32xf32>
    %265 = arith.index_cast %c4_i32 : i32 to index
    %c0_88 = arith.constant 0 : index
    %c0_89 = arith.constant 0 : index
    %266 = vector.load %arg15[%265, %c0_88, %c0_89] : memref<6x2x32xf32, #tpu.memory_space<vmem>>, vector<1x2x32xf32>
    %267 = vector.shape_cast %266 : vector<1x2x32xf32> to vector<2x32xf32>
    %268 = vector.shape_cast %264 : vector<2x32xf32> to vector<1x2x32xf32>
    tpu.vector_store %arg15[%265, %c0_88, %c0_89], %268 {strides = array<i32>} : memref<6x2x32xf32, #tpu.memory_space<vmem>>, vector<1x2x32xf32>,
    %c5_i32 = arith.constant 5 : i32
    %cst_90 = arith.constant dense<0.000000e+00> : vector<2x144xf32>
    %269 = tpu.matmul %264, %17, %cst_90 {dimension_numbers = #tpu.dot_dimension_numbers<[1], [0], [0], [1], [0, 0, 1, 1], [], []>} : vector<2x32xf32>, vector<32x144xf32>, vector<2x144xf32> -> vector<2x144xf32>
    %270 = vector.extract_strided_slice %269 {offsets = [0, 128], sizes = [2, 16], strides = [1, 1]} : vector<2x144xf32> to vector<2x16xf32>
    %271 = vector.shape_cast %270 : vector<2x16xf32> to vector<2x1x16xf32>
    %272 = vector.broadcast %271 : vector<2x1x16xf32> to vector<2x8x16xf32>
    %273 = arith.addf %6, %272 : vector<2x8x16xf32>
    %cst_91 = arith.constant 0.000000e+00 : f32
    %274 = vector.broadcast %cst_91 : f32 to vector<2x8x16xf32>
    %275 = arith.maximumf %273, %274 : vector<2x8x16xf32>
    %276 = vector.shape_cast %18 : vector<1x16xf32> to vector<1x1x16xf32>
    %277 = vector.broadcast %276 : vector<1x1x16xf32> to vector<2x8x16xf32>
    %278 = arith.mulf %275, %277 : vector<2x8x16xf32>
    %cst_92 = arith.constant dense<0.000000e+00> : vector<2x8xf32>
    %279 = vector.multi_reduction <add>, %278, %cst_92 [2] : vector<2x8x16xf32> to vector<2x8xf32>
    %cst_93 = arith.constant dense<0xFF800000> : vector<2xf32>
    %280 = vector.multi_reduction <maximumf>, %279, %cst_93 [1] : vector<2x8xf32> to vector<2xf32>
    %281 = vector.shape_cast %280 : vector<2xf32> to vector<2x1xf32>
    %282 = vector.broadcast %281 : vector<2x1xf32> to vector<2x8xf32>
    %283 = arith.subf %279, %282 : vector<2x8xf32>
    %284 = math.exp %283 : vector<2x8xf32>
    %cst_94 = arith.constant dense<0.000000e+00> : vector<2xf32>
    %285 = vector.multi_reduction <add>, %284, %cst_94 [1] : vector<2x8xf32> to vector<2xf32>
    %286 = vector.shape_cast %285 : vector<2xf32> to vector<2x1xf32>
    %287 = tpu.reciprocal %286 {approx = true} : vector<2x1xf32> -> vector<2x1xf32>
    %288 = vector.broadcast %287 : vector<2x1xf32> to vector<2x8xf32>
    %289 = arith.mulf %284, %288 : vector<2x8xf32>
    %290 = arith.index_cast %c5_i32 : i32 to index
    %c0_95 = arith.constant 0 : index
    %c0_96 = arith.constant 0 : index
    %291 = vector.load %arg13[%290, %c0_95, %c0_96] : memref<6x2x8xf32, #tpu.memory_space<vmem>>, vector<1x2x8xf32>
    %292 = vector.shape_cast %291 : vector<1x2x8xf32> to vector<2x8xf32>
    %293 = vector.shape_cast %289 : vector<2x8xf32> to vector<1x2x8xf32>
    tpu.vector_store %arg13[%290, %c0_95, %c0_96], %293 {strides = array<i32>} : memref<6x2x8xf32, #tpu.memory_space<vmem>>, vector<1x2x8xf32>,
    %294 = vector.shape_cast %289 : vector<2x8xf32> to vector<2x8x1xf32>
    %295 = vector.broadcast %294 : vector<2x8x1xf32> to vector<2x8x128xf32>
    %296 = arith.mulf %295, %8 : vector<2x8x128xf32>
    %cst_97 = arith.constant dense<0.000000e+00> : vector<2x128xf32>
    %297 = vector.multi_reduction <add>, %296, %cst_97 [1] : vector<2x8x128xf32> to vector<2x128xf32>
    %298 = vector.extract_strided_slice %269 {offsets = [0, 0], sizes = [2, 128], strides = [1, 1]} : vector<2x144xf32> to vector<2x128xf32>
    %299 = arith.addf %298, %297 : vector<2x128xf32>
    %300 = arith.index_cast %c5_i32 : i32 to index
    %c0_98 = arith.constant 0 : index
    %c0_99 = arith.constant 0 : index
    %301 = vector.load %arg14[%300, %c0_98, %c0_99] : memref<6x2x128xf32, #tpu.memory_space<vmem>>, vector<1x2x128xf32>
    %302 = vector.shape_cast %301 : vector<1x2x128xf32> to vector<2x128xf32>
    %303 = arith.addf %299, %302 : vector<2x128xf32>
    %304 = vector.extract_strided_slice %303 {offsets = [0, 0], sizes = [2, 96], strides = [1, 1]} : vector<2x128xf32> to vector<2x96xf32>
    %305 = arith.negf %304 : vector<2x96xf32>
    %306 = math.exp %305 : vector<2x96xf32>
    %cst_100 = arith.constant 1.000000e+00 : f32
    %307 = vector.broadcast %cst_100 : f32 to vector<2x96xf32>
    %308 = arith.addf %307, %306 : vector<2x96xf32>
    %309 = arith.divf %307, %308 : vector<2x96xf32>
    %310 = vector.extract_strided_slice %309 {offsets = [0, 0], sizes = [2, 32], strides = [1, 1]} : vector<2x96xf32> to vector<2x32xf32>
    %311 = vector.extract_strided_slice %309 {offsets = [0, 32], sizes = [2, 32], strides = [1, 1]} : vector<2x96xf32> to vector<2x32xf32>
    %312 = vector.extract_strided_slice %309 {offsets = [0, 64], sizes = [2, 32], strides = [1, 1]} : vector<2x96xf32> to vector<2x32xf32>
    %313 = vector.extract_strided_slice %303 {offsets = [0, 96], sizes = [2, 32], strides = [1, 1]} : vector<2x128xf32> to vector<2x32xf32>
    %314 = math.tanh %313 : vector<2x32xf32>
    %315 = arith.mulf %311, %262 : vector<2x32xf32>
    %316 = arith.mulf %310, %314 : vector<2x32xf32>
    %317 = arith.addf %315, %316 : vector<2x32xf32>
    %318 = math.tanh %317 : vector<2x32xf32>
    %319 = arith.mulf %312, %318 : vector<2x32xf32>
    %320 = arith.index_cast %c5_i32 : i32 to index
    %c0_101 = arith.constant 0 : index
    %c0_102 = arith.constant 0 : index
    %321 = vector.load %arg15[%320, %c0_101, %c0_102] : memref<6x2x32xf32, #tpu.memory_space<vmem>>, vector<1x2x32xf32>
    %322 = vector.shape_cast %321 : vector<1x2x32xf32> to vector<2x32xf32>
    %323 = vector.shape_cast %319 : vector<2x32xf32> to vector<1x2x32xf32>
    tpu.vector_store %arg15[%320, %c0_101, %c0_102], %323 {strides = array<i32>} : memref<6x2x32xf32, #tpu.memory_space<vmem>>, vector<1x2x32xf32>,
    %c5_i32_103 = arith.constant 5 : i32
    %c0_104 = arith.constant 0 : index
    %c0_105 = arith.constant 0 : index
    %c0_106 = arith.constant 0 : index
    %324 = vector.load %arg15[%c0_104, %c0_105, %c0_106] : memref<6x2x32xf32, #tpu.memory_space<vmem>>, vector<6x2x32xf32>
    %c0_107 = arith.constant 0 : index
    %c0_108 = arith.constant 0 : index
    %325 = vector.load %arg10[%c0_107, %c0_108] : memref<32x32xf32, #tpu.memory_space<vmem>>, vector<32x32xf32>
    "tpu.trace_start"() <{level = 10 : i32, message = "tbh,hv->tbv"}> : () -> ()
    %cst_109 = arith.constant dense<0.000000e+00> : vector<6x2x32xf32>
    %326 = tpu.matmul %324, %325, %cst_109 {dimension_numbers = #tpu.dot_dimension_numbers<[2], [0], [0, 1], [1], [0, 0, 0, 1, 1, 1], [], []>} : vector<6x2x32xf32>, vector<32x32xf32>, vector<6x2x32xf32> -> vector<6x2x32xf32>
    "tpu.trace_stop"() : () -> ()
    %c0_110 = arith.constant 0 : index
    %c0_111 = arith.constant 0 : index
    %327 = vector.load %arg11[%c0_110, %c0_111] : memref<1x32xf32, #tpu.memory_space<vmem>>, vector<1x32xf32>
    %328 = vector.shape_cast %327 : vector<1x32xf32> to vector<1x1x32xf32>
    %329 = vector.broadcast %328 : vector<1x1x32xf32> to vector<6x2x32xf32>
    %330 = arith.addf %326, %329 : vector<6x2x32xf32>
    %c0_112 = arith.constant 0 : index
    %c0_113 = arith.constant 0 : index
    %c0_114 = arith.constant 0 : index
    %331 = vector.load %arg12[%c0_112, %c0_113, %c0_114] : memref<6x2x32xf32, #tpu.memory_space<vmem>>, vector<6x2x32xf32>
    tpu.vector_store %arg12[%c0_112, %c0_113, %c0_114], %330 {strides = array<i32>} : memref<6x2x32xf32, #tpu.memory_space<vmem>>, vector<6x2x32xf32>,
    return
  }
  func.func @transform_0(%arg0: i32) -> (i32, i32, i32) {
    %c0_i32 = arith.constant 0 : i32
    %c0_i32_0 = arith.constant 0 : i32
    %c0_i32_1 = arith.constant 0 : i32
    %c0_i32_2 = arith.constant 0 : i32
    return %c0_i32, %c0_i32_0, %c0_i32_1 : i32, i32, i32
  }
  func.func @transform_1(%arg0: i32) -> (i32, i32, i32) {
    %c0_i32 = arith.constant 0 : i32
    %c0_i32_0 = arith.constant 0 : i32
    %c0_i32_1 = arith.constant 0 : i32
    %c0_i32_2 = arith.constant 0 : i32
    return %c0_i32, %c0_i32_0, %c0_i32_1 : i32, i32, i32
  }
  func.func @transform_2(%arg0: i32) -> (i32, i32) {
    %c0_i32 = arith.constant 0 : i32
    %c0_i32_0 = arith.constant 0 : i32
    %c0_i32_1 = arith.constant 0 : i32
    return %c0_i32, %c0_i32_0 : i32, i32
  }
  func.func @transform_3(%arg0: i32) -> (i32, i32) {
    %c0_i32 = arith.constant 0 : i32
    %c0_i32_0 = arith.constant 0 : i32
    %c0_i32_1 = arith.constant 0 : i32
    return %c0_i32, %c0_i32_0 : i32, i32
  }
  func.func @transform_4(%arg0: i32) -> (i32, i32) {
    %c0_i32 = arith.constant 0 : i32
    %c0_i32_0 = arith.constant 0 : i32
    %c0_i32_1 = arith.constant 0 : i32
    return %c0_i32, %c0_i32_0 : i32, i32
  }
  func.func @transform_5(%arg0: i32) -> (i32, i32) {
    %c0_i32 = arith.constant 0 : i32
    %c0_i32_0 = arith.constant 0 : i32
    %c0_i32_1 = arith.constant 0 : i32
    return %c0_i32, %c0_i32_0 : i32, i32
  }
  func.func @transform_6(%arg0: i32) -> (i32, i32) {
    %c0_i32 = arith.constant 0 : i32
    %c0_i32_0 = arith.constant 0 : i32
    %c0_i32_1 = arith.constant 0 : i32
    return %c0_i32, %c0_i32_0 : i32, i32
  }
  func.func @transform_7(%arg0: i32) -> (i32, i32) {
    %c0_i32 = arith.constant 0 : i32
    %c0_i32_0 = arith.constant 0 : i32
    %c0_i32_1 = arith.constant 0 : i32
    return %c0_i32, %c0_i32_0 : i32, i32
  }
  func.func @transform_8(%arg0: i32) -> (i32, i32) {
    %c0_i32 = arith.constant 0 : i32
    %c0_i32_0 = arith.constant 0 : i32
    %c0_i32_1 = arith.constant 0 : i32
    return %c0_i32, %c0_i32_0 : i32, i32
  }
  func.func @transform_9(%arg0: i32) -> (i32, i32) {
    %c0_i32 = arith.constant 0 : i32
    %c0_i32_0 = arith.constant 0 : i32
    %c0_i32_1 = arith.constant 0 : i32
    return %c0_i32, %c0_i32_0 : i32, i32
  }
  func.func @transform_10(%arg0: i32) -> (i32, i32) {
    %c0_i32 = arith.constant 0 : i32
    %c0_i32_0 = arith.constant 0 : i32
    %c0_i32_1 = arith.constant 0 : i32
    return %c0_i32, %c0_i32_0 : i32, i32
  }
  func.func @transform_11(%arg0: i32) -> (i32, i32, i32) {
    %c0_i32 = arith.constant 0 : i32
    %c0_i32_0 = arith.constant 0 : i32
    %c0_i32_1 = arith.constant 0 : i32
    %c0_i32_2 = arith.constant 0 : i32
    return %c0_i32, %c0_i32_0, %c0_i32_1 : i32, i32, i32
  }
  func.func @transform_12(%arg0: i32) -> (i32, i32, i32) {
    %c0_i32 = arith.constant 0 : i32
    %c0_i32_0 = arith.constant 0 : i32
    %c0_i32_1 = arith.constant 0 : i32
    %c0_i32_2 = arith.constant 0 : i32
    return %c0_i32, %c0_i32_0, %c0_i32_1 : i32, i32, i32
  }
}

</mosaic_0001>

<bundles_post_ra>
// kernel: decoder_forward.1
= control target key start
LH: loop header
LB: loop body
LE: loop exit
PB: predicated region body
PF: predicated region fallthrough
CT: control target
= control target key end

     0   :  { %18 = vsyncpa [#allocation5], 0  ;;  %vm52_vm0 = vcmask 130048   ;;  %s1954_s0 = inlined_call_operand.vmem [shape: f32[2,8,16], index: 0, kind: input, shape index: {}]   ;;  %s1955_s1 = inlined_call_operand.vmem [shape: f32[6,2,16], index: 1, kind: input, shape index: {}]   ;;  %s1956_s2 = inlined_call_operand.vmem [shape: f32[16,16], index: 2, kind: input, shape index: {}]   ;;  %s1957_s3 = inlined_call_operand.vmem [shape: f32[32,144], index: 3, kind: input, shape index: {}]   ;;  %s1958_s4 = inlined_call_operand.vmem [shape: f32[8,1], index: 4, kind: input, shape index: {}]   ;;  %s1959_s5 = inlined_call_operand.vmem [shape: f32[1,16], index: 5, kind: input, shape index: {}]   ;;  %s1960_s6 = inlined_call_operand.vmem [shape: f32[16,128], index: 6, kind: input, shape index: {}]   ;;  %s1961_s7 = inlined_call_operand.vmem [shape: f32[16,128], index: 7, kind: input, shape index: {}]   ;;  %s1962_s8 = inlined_call_operand.vmem [shape: f32[1,128], index: 8, kind: input, shape index: {}]   ;;  %s1963_s9 = inlined_call_operand.vmem [shape: f32[32,32], index: 9, kind: input, shape index: {}]   ;;  %s1964_s10 = inlined_call_operand.vmem [shape: f32[1,32], index: 10, kind: input, shape index: {}]   ;;  %s1965_s11 = inlined_call_operand.hbm [shape: f32[6,2,32], index: 11, kind: output, shape index: {0}]   ;;  %s1966_s12 = inlined_call_operand.hbm [shape: f32[6,2,8], index: 12, kind: output, shape index: {1}]  }
   0x1   :  { %v45_v0 = vld [vmem:[%s1956_s2 + $0x8] sm:$0xff]  ;;  %v44_v1 = vld [vmem:[%s1956_s2] sm:$0xff] }
   0x2   :  { %1400 = vmatpush.msra.mxu1 %v45_v0  ;;  %v43_v2 = vld [vmem:[%s1954_s0 + $0x8] sm:$0xff]  ;;  %73 = vmatpush.msra.mxu0 %v45_v0  ;;  %v113_v5 = vld [vmem:[%s1961_s7] sm:$0xff] }
   0x3   :  { %v83_v3 = vld [vmem:[%s1960_s6 + $0x8] sm:$0xff]  ;;  %v107_v6 = vld [vmem:[%s1955_s1] sm:$0x3]  ;;  %v108_v7 = vld [vmem:[%s1955_s1 + $0x2] sm:$0x3] }
   0x4   :  { %v114_v4 = vld [vmem:[%s1961_s7 + $0x8] sm:$0xff]  ;;  %1401 = vmatpush.msra.mxu1 %v44_v1  ;;  %v109_v8 = vld [vmem:[%s1955_s1 + $0x4] sm:$0x3]  ;;  %v110_v9 = vld [vmem:[%s1955_s1 + $0x6] sm:$0x3]  ;;  %74 = vmatpush.msra.mxu0 %v44_v1 }
   0x5   :  { %170 = vmatpush.msra.mxu2 %v114_v4  ;;  %124 = vst [vmem:[#allocation1] ss:$4 sm:$0xff] %v107_v6  ;;  %1376 = vmatmul.msk.f32.vlgmr.msra.gmra.mxu1 %vm52_vm0, %v43_v2  ;;  %v82_v10 = vld [vmem:[%s1960_s6] sm:$0xff] }
   0x6   :  { %126 = vst [vmem:[#allocation1 + $0x1] ss:$4 sm:$0xff] %v108_v7  ;;  %v42_v11 = vld [vmem:[%s1954_s0] sm:$0xff]  ;;  %98 = vmatpush.msrb.mxu1 %v83_v3 }
   0x7   :  { %171 = vmatpush.msra.mxu2 %v113_v5  ;;  %128 = vst [vmem:[#allocation1 + $0x2] ss:$4 sm:$0xff] %v109_v8  ;;  %1375 = vmatmul.msk.f32.vlgmr.msra.gmra.mxu0 %vm52_vm0, %v42_v11 }
   0x8   :  { %130 = vst [vmem:[#allocation1 + $0x3] ss:$4 sm:$0xff] %v110_v9 }
   0x9   :  { %19 = vsyncpa [#allocation7], 0  ;;  %99 = vmatpush.msrb.mxu1 %v82_v10  ;;  %v1673_v13 = vld [vmem:[%s1962_s8] ss:$0 sm:$0xff]  ;;  %v1556_v15 = vmov 8.0   ;;  %s1557_s0 = smov 32  }
   0xa   :  { %1416 = vrcp.f32 %v1556_v15  ;;  %v1558_v57 = vmov 0   ;;  %vm311_vm10 = vcmask 1041409   ;;  %s1559_s15 = smov 64   ;;  %vm316_vm11 = vcmask 254976   ;;  %s1358_s17 = sshll.u32 %s1966_s12, 4  ;;  %s1359_s17 = int_to_ptr.hbm [resolvable:$true] %s1358_s17 }
   0xb   :  { %1410 = vset.pattern.permute.xlu1 %v1558_v57  ;;  %1412 = vset.pattern.permute.xlu0 %v1558_v57  ;;  %vm318_vm12 = vcmask 261120   ;;  %vm204_vm13 = vcmask 58368   ;;  %s1563_s18 = smov [#allocation4]   ;;  %s1345_s7 = sshll.u32 %s1965_s11, 4  ;;  %s1346_s7 = int_to_ptr.hbm [resolvable:$true] %s1345_s7 }
   0xc   :  { %1411 = vset.pattern.permute.xlu2 %v1558_v57  ;;  %s1343_s19 = sshll.u32 %s1563_s18, 4  ;;  %s1344_s19 = int_to_ptr.vmem [resolvable:$true] %s1343_s19 }
   0xd   :  { %1377 = vmatmul.msk.f32.vlgmr.msrb.gmra.mxu1 %vm52_vm0, %v42_v11 }
   0xf   :  { %v135_v12 = vld.sshfl [vmem:[#allocation1] sm:$0xff pattern:$0x73625140] }
  0x10   :  { %1379 = vmatmul.msk.f32.vlgmr.msra.gmra.mxu2 %vm52_vm0, %v135_v12  ;;  %137 = vst [vmem:[#allocation1] ss:$4 sm:$0xff] %v1673_v13  ;;  %v1417_v17 = vpop.eup %1416 }
  0x11   :  { %139 = vst [vmem:[#allocation1 + $0x1] ss:$4 sm:$0xff] %v1673_v13  ;;  %v219_v19 = vmul.f32 8.0, %v1417_v17  ;;  %vm223_vm1 = vweird.f32 %v1417_v17 }
  0x12   :  { %141 = vst [vmem:[#allocation1 + $0x2] ss:$4 sm:$0xff] %v1673_v13 }
  0x13   :  { %143 = vst [vmem:[#allocation1 + $0x3] ss:$4 sm:$0xff] %v1673_v13  ;;  %v220_v24 = vsub.f32 1.0, %v219_v19 }
  0x15   :  { %1378 = vmatmul.msk.f32.gmra.mxu1 %vm52_vm0, %v43_v2  ;;  %v221_v32 = vmul.f32 %v1417_v17, %v220_v24 }
  0x17   :  { %v222_v36 = vadd.f32 %v1417_v17, %v221_v32  ;;  %v201_v32 = vld [vmem:[%s1957_s3 + $0x30] sm:$0xff] }
  0x18   :  { %333 = vmatpush.msra.mxu3 %v201_v32  ;;  %527 = vmatpush.msrb.mxu0 %v201_v32 }
  0x19   :  { %v224_v42 = vsel %vm223_vm1, %v1417_v17, %v222_v36  ;;  %711 = vmatpush.msrb.mxu2 %v201_v32 }
  0x1a   :  { %v148_v21 = vld.sshfl [vmem:[#allocation1] sm:$0xff pattern:$0x73625140] }
  0x82   :  { %v1679_v14 = vpop.f32.mrf.mxu1 }
  0x8a   :  { %v1681_v16 = vpop.f32.mrf.mxu1 }
  0x8b   :  { %v206_v18 = vrot.slane %v1681_v16, 4 }
  0x8d   :  { %v207_v20 = vadd.f32 %v206_v18, %v1681_v16 }
  0x8f   :  { %v208_v25 = vrot.slane %v207_v20, 2 }
  0x91   :  { %v209_v33 = vadd.f32 %v208_v25, %v207_v20  ;;  %v46_v20 = vld [vmem:[%s1958_s4] sm:$0xff] }
  0x92   :  { %v1685_v23 = vpop.f32.mrf.mxu1 }
  0x93   :  { %v173_v22 = vpop.f32.mrf.mxu2  ;;  %v212_v27 = vrot.slane %v1685_v23, 4  ;;  %v210_v37 = vrot.slane %v209_v33, 1 }
  0x94   :  { %v174_v26 = vadd.f32 %v173_v22, %v148_v21 }
  0x95   :  { %v213_v31 = vadd.f32 %v212_v27, %v1685_v23  ;;  %v211_v43 = vadd.f32 %v210_v37, %v209_v33  ;;  %v199_v33 = vld [vmem:[%s1957_s3 + $0x20] sm:$0xff] }
  0x96   :  { %v181_v28 = vrot.slane %v174_v26, 2  ;;  %v182_v29 = vrot.slane %v174_v26, 4  ;;  %v183_v30 = vrot.slane %v174_v26, 6  ;;  %189 = vst [vmem:[#allocation2] sm:$0x3] %v174_v26  ;;  %334 = vmatpush.msra.mxu3 %v199_v33  ;;  %528 = vmatpush.msrb.mxu0 %v199_v33 }
  0x97   :  { %v214_v34 = vrot.slane %v213_v31, 2  ;;  %v225_v46 = vmul.f32 %v224_v42, %v211_v43  ;;  %712 = vmatpush.msrb.mxu2 %v199_v33  ;;  %v200_v43 = vld [vmem:[%s1957_s3 + $0x28] sm:$0xff] }
  0x98   :  { %190 = vst [vmem:[#allocation2 + $0x2] sm:$0x3] %v181_v28 }
  0x99   :  { %191 = vst [vmem:[#allocation2 + $0x4] sm:$0x3] %v182_v29  ;;  %v215_v35 = vadd.f32 %v214_v34, %v213_v31  ;;  %v197_v34 = vld [vmem:[%s1957_s3 + $0x10] sm:$0xff] }
  0x9a   :  { %192 = vst [vmem:[#allocation2 + $0x6] sm:$0x3] %v183_v30  ;;  %335 = vmatpush.msra.mxu3 %v197_v34  ;;  %529 = vmatpush.msrb.mxu0 %v197_v34 }
  0x9b   :  { %v216_v38 = vrot.slane %v215_v35, 1  ;;  %713 = vmatpush.msrb.mxu2 %v197_v34 }
  0x9d   :  { %v227_v39 = vld [vmem:[#allocation2] sm:$0x3]  ;;  %v217_v40 = vadd.f32 %v216_v38, %v215_v35  ;;  %v195_v35 = vld [vmem:[%s1957_s3] sm:$0xff] }
  0x9e   :  { %v229_v41 = vrot.slane %v227_v39, 1  ;;  %v232_v47 = vadd.f32 %v227_v39, %v225_v46  ;;  %336 = vmatpush.msra.mxu3 %v195_v35  ;;  %530 = vmatpush.msrb.mxu0 %v195_v35 }
  0x9f   :  { %v226_v44 = vmul.f32 %v224_v42, %v217_v40  ;;  %714 = vmatpush.msrb.mxu2 %v195_v35  ;;  %v202_v42 = vld [vmem:[%s1957_s3 + $0x38] sm:$0xff] }
  0xa0   :  { %v1381_v51 = vmul.f32 -1.442695, %v232_v47  ;;  %895 = vmatpush.msra.mxu0 %v201_v32  ;;  %353 = vmatpush.msrb.mxu3 %v202_v42 }
  0xa1   :  { %v233_v45 = vadd.f32 %v229_v41, %v226_v44  ;;  %1079 = vmatpush.msra.mxu2 %v201_v32  ;;  %547 = vmatpush.msra.mxu1 %v202_v42  ;;  %v198_v44 = vld [vmem:[%s1957_s3 + $0x18] sm:$0xff] }
  0xa2   :  { %896 = vmatpush.msra.mxu0 %v199_v33  ;;  %354 = vmatpush.msrb.mxu3 %v200_v43 }
  0xa3   :  { %1418 = vtanh.f32 %v233_v45  ;;  %v1382_v50 = vmul.f32 -1.442695, %v233_v45  ;;  %1080 = vmatpush.msra.mxu2 %v199_v33  ;;  %548 = vmatpush.msra.mxu1 %v200_v43  ;;  %v196_v45 = vld [vmem:[%s1957_s3 + $0x8] sm:$0xff] }
  0xa4   :  { %1420 = vtanh.f32 %v232_v47  ;;  %897 = vmatpush.msra.mxu0 %v197_v34  ;;  %355 = vmatpush.msrb.mxu3 %v198_v44 }
  0xa5   :  { %1422 = vpow2.f32 %v1382_v50  ;;  %1081 = vmatpush.msra.mxu2 %v197_v34  ;;  %549 = vmatpush.msra.mxu1 %v198_v44 }
  0xa6   :  { %1424 = vpow2.f32 %v1381_v51  ;;  %898 = vmatpush.msra.mxu0 %v195_v35  ;;  %356 = vmatpush.msrb.mxu3 %v196_v45 }
  0xa7   :  { %1082 = vmatpush.msra.mxu2 %v195_v35  ;;  %550 = vmatpush.msra.mxu1 %v196_v45 }
  0xa9   :  { %v1419_v48 = vpop.eup %1418  ;;  %915 = vmatpush.msrb.mxu1 %v202_v42 }
  0xaa   :  { %280 = vrot.lane.b32.xlu0 %v1419_v48, %s1557_s0  ;;  %v1421_v49 = vpop.eup %1420 }
  0xab   :  { %v1423_v52 = vpop.eup %1422  ;;  %916 = vmatpush.msrb.mxu1 %v200_v43 }
  0xac   :  { %v241_v53 = vadd.f32 1.0, %v1423_v52  ;;  %v1425_v54 = vpop.eup %1424 }
  0xad   :  { %v240_v55 = vadd.f32 1.0, %v1425_v54  ;;  %917 = vmatpush.msrb.mxu1 %v198_v44 }
  0xae   :  { %1426 = vrcp.f32 %v241_v53  ;;  %v268_v1 = vand.u32 2147483648, %v241_v53  ;;  %vm262_vm3 = vweird.f32 %v241_v53  ;;  %v266_v2 = vand.u32 2147483647, %v241_v53 }
  0xaf   :  { %1428 = vrcp.f32 %v240_v55  ;;  %v253_v10 = vand.u32 2147483648, %v240_v55  ;;  %vm247_vm7 = vweird.f32 %v240_v55  ;;  %v251_v11 = vand.u32 2147483647, %v240_v55  ;;  %918 = vmatpush.msrb.mxu1 %v196_v45 }
  0xb0   :  { %v269_v5 = vor.u32 1.1754944e-38, %v268_v1  ;;  %vm267_vm5 = vcmp.eq.f32.partialorder %v266_v2, 8.507059e+37  ;;  %v384_v1 = vlaneseq }
  0xb1   :  { %v254_v15 = vor.u32 1.1754944e-38, %v253_v10  ;;  %vm252_vm9 = vcmp.eq.f32.partialorder %v251_v11, 8.507059e+37 }
  0xb2   :  { %278 = vrot.lane.b32.xlu0 %v1421_v49, %s1557_s0  ;;  %v76_v49 = vpop.f32.mrf.mxu0  ;;  %v1748_v2 = vand.u32 127, %v384_v1 }
  0xb4   :  { %v1427_v56 = vpop.eup %1426 }
  0xb5   :  { %v258_v58 = vmul.f32 %v1427_v56, %v241_v53  ;;  %v1429_v60 = vpop.eup %1428  ;;  %vm263_vm2 = vweird.f32 %v1427_v56 }
  0xb6   :  { %v243_v62 = vmul.f32 %v1429_v60, %v240_v55  ;;  %vm264_vm4 = vmor %vm262_vm3, %vm263_vm2  ;;  %vm248_vm6 = vweird.f32 %v1429_v60 }
  0xb7   :  { %v259_v59 = vsub.f32 1.0, %v258_v58  ;;  %vm249_vm8 = vmor %vm247_vm7, %vm248_vm6  ;;  %v1741_v58 = vld [vmem:[%s1959_s5] ss:$0 sm:$0xff] }
  0xb8   :  { %v244_v0 = vsub.f32 1.0, %v243_v62 }
  0xb9   :  { %v260_v61 = vmul.f32 %v1427_v56, %v259_v59 }
  0xba   :  { %v245_v4 = vmul.f32 %v1429_v60, %v244_v0 }
  0xbb   :  { %v261_v63 = vadd.f32 %v1427_v56, %v260_v61 }
  0xbc   :  { %v246_v9 = vadd.f32 %v1429_v60, %v245_v4 }
  0xbd   :  { %v265_v3 = vsel %vm264_vm4, %v1427_v56, %v261_v63 }
  0xbe   :  { %v270_v7 = vsel %vm267_vm5, %v269_v5, %v265_v3  ;;  %v250_v12 = vsel %vm249_vm8, %v1429_v60, %v246_v9 }
  0xbf   :  { %v255_v17 = vsel %vm252_vm9, %v254_v15, %v250_v12  ;;  %v275_v21 = vmul.f32 0.0, %v270_v7 }
  0xc0   :  { %v274_v25 = vmul.f32 0.0, %v255_v17 }
 0x11c   :  { %v281_v6 = vpop.permute.xlu0 %280 }
 0x11d   :  { %v285_v8 = vmul.f32 %v281_v6, %v270_v7 }
 0x11f   :  { %290 = vrot.lane.b32.xlu1 %v285_v8, %s1557_s0 }
 0x124   :  { %v279_v18 = vpop.permute.xlu0 %278 }
 0x125   :  { %v284_v19 = vmul.f32 %v279_v18, %v255_v17 }
 0x127   :  { %288 = vrot.lane.b32.xlu1 %v284_v19, %s1557_s0 }
 0x12f   :  { %49 = vperm.xlu1 %1410, %v46_v20  }
 0x191   :  { %v291_v22 = vpop.permute.xlu1 %290 }
 0x192   :  { %v295_v24 = vadd.f32 %v291_v22, %v275_v21 }
 0x194   :  { %1430 = vtanh.f32 %v295_v24  ;;  %v487_v28 = vrot.slane %v295_v24, 7 }
 0x199   :  { %v289_v26 = vpop.permute.xlu1 %288 }
 0x19a   :  { %v1431_v27 = vpop.eup %1430  ;;  %v294_v29 = vadd.f32 %v289_v26, %v274_v25 }
 0x19b   :  { %302 = vrot.lane.b32.xlu2 %v1431_v27, %s1557_s0 }
 0x19c   :  { %1432 = vtanh.f32 %v294_v29  ;;  %v1698_v30 = vsel %vm311_vm10, %v487_v28, %v294_v29 }
 0x1a1   :  { %v50_v50 = vpop.permute.xlu1 %49 }
 0x1a2   :  { %v1433_v31 = vpop.eup %1432  ;;  %v1732_v51 = vadd.f32 %v76_v49, %v50_v50  ;;  %v1735_v55 = vadd.f32 %v1679_v14, %v50_v50 }
 0x1a3   :  { %300 = vrot.lane.b32.xlu2 %v1433_v31, %s1557_s0 }
 0x1f5   :  { %v303_v36 = vpop.permute.xlu2 %302 }
 0x1f6   :  { %v307_v37 = vmul.f32 %v303_v36, %v270_v7 }
 0x1f8   :  { %v310_v39 = vrot.slane %v307_v37, 7 }
 0x1fd   :  { %v301_v38 = vpop.permute.xlu2 %300 }
 0x1fe   :  { %v306_v40 = vmul.f32 %v301_v38, %v255_v17 }
 0x200   :  { %v312_v41 = vsel %vm311_vm10, %v310_v39, %v306_v40 }
 0x201   :  { %313 = vrot.lane.b32.xlu0 %v312_v41, %s1559_s15 }
 0x273   :  { %v314_v46 = vpop.permute.xlu0 %313 }
 0x274   :  { %317 = vst.msk [vmem:[#allocation3] sm:$0x3] %vm316_vm11, %v314_v46  ;;  %1383 = vmatmul.msk.f32.vlgmr.msra.gmra.mxu3 %vm318_vm12, %v314_v46 }
 0x275   :  { %731 = vmatpush.msra.mxu3 %v202_v42 }
 0x277   :  { %732 = vmatpush.msra.mxu3 %v200_v43 }
 0x279   :  { %733 = vmatpush.msra.mxu3 %v198_v44 }
 0x27b   :  { %734 = vmatpush.msra.mxu3 %v196_v45  ;;  %v1249_v47 = vld [vmem:[#allocation3] sm:$0x3] }
 0x27c   :  { %1384 = vmatmul.msk.f32.vlgmr.msrb.gmra.mxu3 %vm318_vm12, %v314_v46  ;;  %1268 = vst [vmem:[#allocation1] ss:$4 sm:$0xff] %v1249_v47 }
 0x27d   :  { %1099 = vmatpush.msrb.mxu3 %v202_v42 }
 0x27f   :  { %1100 = vmatpush.msrb.mxu3 %v200_v43 }
 0x281   :  { %1101 = vmatpush.msrb.mxu3 %v198_v44 }
 0x283   :  { %1102 = vmatpush.msrb.mxu3 %v196_v45 }
 0x2f7   :  { %v1730_v48 = vpop.f32.mrf.mxu3 }
 0x2ff   :  { %v358_v52 = vpop.f32.mrf.mxu3 }
 0x300   :  { %v362_v53 = vrot.slane %v358_v52, 1  ;;  %v363_v54 = vperm.slane %v358_v52, 0 }
 0x302   :  { %v364_v56 = vperm.slane %v362_v53, 0  ;;  %v367_v57 = vadd.f32 %v363_v54, %v1732_v51 }
 0x304   :  { %v368_v59 = vadd.f32 %v364_v56, %v1735_v55  ;;  %v369_v60 = vmax.f32 %v367_v57, 0.0 }
 0x306   :  { %v374_v61 = vmul.f32 %v1741_v58, %v369_v60  ;;  %v370_v62 = vmax.f32 %v368_v59, 0.0  ;;  %v463_v60 = vld [vmem:[#allocation2 + $0x2] sm:$0x3] }
 0x308   :  { %v376_v63 = vsel %vm52_vm0, %v374_v61, 0.0  ;;  %v375_v0 = vmul.f32 %v1741_v58, %v370_v62 }
 0x309   :  { %377 = vadd.xlane.f32.xlu2 %v376_v63 }
 0x30a   :  { %v379_v14 = vsel %vm52_vm0, %v375_v0, 0.0 }
 0x30b   :  { %380 = vadd.xlane.f32.xlu0 %v379_v14 }
 0x37c   :  { %v378_v3 = vpop.xlane.xlu2 %377 }
 0x37d   :  { %v386_v5 = vperm.slane %v378_v3, %v1748_v2 }
 0x37e   :  { %v381_v4 = vpop.xlane.xlu0 %380 }
 0x37f   :  { %v387_v6 = vperm.slane %v381_v4, %v1748_v2 }
 0x381   :  { %v388_v7 = vsel %vm311_vm10, %v387_v6, %v386_v5 }
 0x382   :  { %v390_v8 = vsel %vm204_vm13, %v388_v7, -inf }
 0x383   :  { %391 = vmax.xlane.f32.xlu1 %v390_v8 }
 0x3f6   :  { %v392_v9 = vpop.xlane.xlu1 %391 }
 0x3f7   :  { %v394_v10 = vperm.slane %v392_v9, 0  ;;  %v395_v11 = vperm.slane %v392_v9, 1 }
 0x3f9   :  { %v398_v12 = vsub.f32 %v378_v3, %v394_v10  ;;  %v399_v15 = vsub.f32 %v381_v4, %v395_v11 }
 0x3fb   :  { %v400_v17 = vmul.f32 1.442695, %v398_v12  ;;  %v402_v18 = vmul.f32 1.442695, %v399_v15 }
 0x3fd   :  { %1434 = vpow2.f32 %v400_v17 }
 0x3fe   :  { %1436 = vpow2.f32 %v402_v18 }
 0x403   :  { %v1435_v19 = vpop.eup %1434 }
 0x404   :  { %v1437_v20 = vpop.eup %1436  ;;  %407 = vperm.xlu2 %1411, %v1435_v19  }
 0x405   :  { %410 = vperm.xlu0 %1412, %v1437_v20  }
 0x45e   :  { %v408_v21 = vpop.permute.xlu2 %407 }
 0x45f   :  { %v412_v24 = vperm.slane %v408_v21, %v1748_v2 }
 0x477   :  { %v411_v22 = vpop.permute.xlu0 %410 }
 0x478   :  { %v413_v25 = vperm.slane %v411_v22, %v1748_v2 }
 0x47a   :  { %v414_v26 = vsel %vm311_vm10, %v413_v25, %v412_v24 }
 0x47b   :  { %v416_v27 = vsel %vm204_vm13, %v414_v26, 0.0 }
 0x47c   :  { %417 = vadd.xlane.f32.xlu1 %v416_v27 }
 0x4ef   :  { %v418_v28 = vpop.xlane.xlu1 %417 }
 0x4f0   :  { %1438 = vrcp.f32 %v418_v28 }
 0x4f6   :  { %v1439_v29 = vpop.eup %1438 }
 0x4f7   :  { %v422_v31 = vperm.slane %v1439_v29, 1  ;;  %v421_v32 = vperm.slane %v1439_v29, 0 }
 0x4f9   :  { %v426_v33 = vmul.f32 %v1437_v20, %v422_v31  ;;  %v425_v34 = vmul.f32 %v1435_v19, %v421_v32 }
 0x4fb   :  { %433 = vperm.xlu2 %1411, %v426_v33   ;;  %430 = vperm.xlu1 %1410, %v425_v34  }
 0x555   :  { %v434_v35 = vpop.permute.xlu2 %433 }
 0x556   :  { %v444_v36 = vmul.f32 %v434_v35, %v1685_v23  ;;  %v436_v40 = vperm.slane %v434_v35, %v1748_v2 }
 0x558   :  { %v451_v37 = vrot.slane %v444_v36, 4 }
 0x55a   :  { %v452_v38 = vadd.f32 %v451_v37, %v444_v36 }
 0x55c   :  { %v453_v41 = vrot.slane %v452_v38, 2 }
 0x55e   :  { %v454_v46 = vadd.f32 %v453_v41, %v452_v38 }
 0x560   :  { %v455_v50 = vrot.slane %v454_v46, 1 }
 0x562   :  { %v456_v54 = vadd.f32 %v455_v50, %v454_v46 }
 0x56d   :  { %v431_v39 = vpop.permute.xlu1 %430 }
 0x56e   :  { %v435_v42 = vperm.slane %v431_v39, %v1748_v2  ;;  %v443_v43 = vmul.f32 %v431_v39, %v1681_v16 }
 0x570   :  { %v437_v44 = vsel %vm311_vm10, %v436_v40, %v435_v42  ;;  %v445_v45 = vrot.slane %v443_v43, 4 }
 0x571   :  { %440 = vst.msk [vmem:[#allocation6 + $0x2] sm:$0x3] %vm204_vm13, %v437_v44 }
 0x572   :  { %v446_v47 = vadd.f32 %v445_v45, %v443_v43 }
 0x574   :  { %v447_v49 = vrot.slane %v446_v47, 2 }
 0x576   :  { %v448_v52 = vadd.f32 %v447_v49, %v446_v47 }
 0x578   :  { %v449_v53 = vrot.slane %v448_v52, 1 }
 0x57a   :  { %v450_v56 = vadd.f32 %v449_v53, %v448_v52 }
 0x57c   :  { %v459_v57 = vsel %vm311_vm10, %v456_v54, %v450_v56 }
 0x57d   :  { %v461_v59 = vadd.f32 %v459_v57, %v1730_v48 }
 0x57f   :  { %v464_v61 = vadd.f32 %v463_v60, %v461_v59 }
 0x581   :  { %1440 = vtanh.f32 %v464_v61  ;;  %v1385_v63 = vmul.f32 -1.442695, %v464_v61 }
 0x583   :  { %1442 = vpow2.f32 %v1385_v63 }
 0x587   :  { %v1441_v62 = vpop.eup %1440 }
 0x588   :  { %492 = vrot.lane.b32.xlu2 %v1441_v62, %s1557_s0 }
 0x589   :  { %v1443_v0 = vpop.eup %1442 }
 0x58a   :  { %v468_v14 = vadd.f32 1.0, %v1443_v0 }
 0x58c   :  { %1444 = vrcp.f32 %v468_v14  ;;  %v480_v7 = vand.u32 2147483648, %v468_v14  ;;  %vm474_vm15 = vweird.f32 %v468_v14  ;;  %v478_v48 = vand.u32 2147483647, %v468_v14 }
 0x58e   :  { %v481_v9 = vor.u32 1.1754944e-38, %v480_v7  ;;  %vm479_vm2 = vcmp.eq.f32.partialorder %v478_v48, 8.507059e+37 }
 0x592   :  { %v1445_v1 = vpop.eup %1444 }
 0x593   :  { %v470_v3 = vmul.f32 %v1445_v1, %v468_v14  ;;  %vm475_vm14 = vweird.f32 %v1445_v1 }
 0x594   :  { %vm476_vm1 = vmor %vm474_vm15, %vm475_vm14 }
 0x595   :  { %v471_v4 = vsub.f32 1.0, %v470_v3 }
 0x597   :  { %v472_v5 = vmul.f32 %v1445_v1, %v471_v4 }
 0x599   :  { %v473_v6 = vadd.f32 %v1445_v1, %v472_v5 }
 0x59b   :  { %v477_v8 = vsel %vm476_vm1, %v1445_v1, %v473_v6 }
 0x59c   :  { %v482_v11 = vsel %vm479_vm2, %v481_v9, %v477_v8 }
 0x59d   :  { %v490_v15 = vmul.f32 %v1698_v30, %v482_v11 }
 0x5e2   :  { %v493_v10 = vpop.permute.xlu2 %492 }
 0x5e3   :  { %v495_v12 = vmul.f32 %v493_v10, %v482_v11 }
 0x5e5   :  { %497 = vrot.lane.b32.xlu2 %v495_v12, %s1557_s0 }
 0x63f   :  { %v498_v17 = vpop.permute.xlu2 %497 }
 0x640   :  { %v1769_v18 = vadd.f32 %v498_v17, %v490_v15 }
 0x642   :  { %1446 = vtanh.f32 %v1769_v18 }
 0x648   :  { %v1447_v19 = vpop.eup %1446 }
 0x649   :  { %503 = vrot.lane.b32.xlu1 %v1447_v19, %s1557_s0 }
 0x6bb   :  { %v504_v20 = vpop.permute.xlu1 %503 }
 0x6bc   :  { %v506_v21 = vmul.f32 %v504_v20, %v482_v11 }
 0x6be   :  { %508 = vrot.lane.b32.xlu2 %v506_v21, %s1559_s15 }
 0x718   :  { %v509_v22 = vpop.permute.xlu2 %508 }
 0x719   :  { %512 = vst.msk [vmem:[#allocation3 + $0x2] sm:$0x3] %vm316_vm11, %v509_v22  ;;  %1386 = vmatmul.msk.f32.vlgmr.msrb.gmra.mxu0 %vm318_vm12, %v509_v22  ;;  %1387 = vmatmul.msk.f32.vlgmr.msra.gmra.mxu1 %vm318_vm12, %v509_v22 }
 0x720   :  { %v1250_v30 = vld [vmem:[#allocation3 + $0x2] sm:$0x3] }
 0x721   :  { %1270 = vst [vmem:[#allocation1 + $0x1] ss:$4 sm:$0xff] %v1250_v30 }
 0x796   :  { %v552_v24 = vpop.f32.mrf.mxu1 }
 0x797   :  { %v556_v25 = vrot.slane %v552_v24, 1  ;;  %v557_v26 = vperm.slane %v552_v24, 0 }
 0x799   :  { %v558_v27 = vperm.slane %v556_v25, 0  ;;  %v561_v28 = vadd.f32 %v557_v26, %v1732_v51  ;;  %v532_v26 = vpop.f32.mrf.mxu0 }
 0x79b   :  { %v562_v29 = vadd.f32 %v558_v27, %v1735_v55  ;;  %v563_v31 = vmax.f32 %v561_v28, 0.0 }
 0x79d   :  { %v565_v32 = vmul.f32 %v1741_v58, %v563_v31  ;;  %v564_v33 = vmax.f32 %v562_v29, 0.0  ;;  %v652_v29 = vld [vmem:[#allocation2 + $0x4] sm:$0x3] }
 0x79f   :  { %v567_v34 = vsel %vm52_vm0, %v565_v32, 0.0  ;;  %v566_v35 = vmul.f32 %v1741_v58, %v564_v33 }
 0x7a0   :  { %568 = vadd.xlane.f32.xlu0 %v567_v34 }
 0x7a1   :  { %v570_v36 = vsel %vm52_vm0, %v566_v35, 0.0 }
 0x7a2   :  { %571 = vadd.xlane.f32.xlu1 %v570_v36 }
 0x813   :  { %v569_v37 = vpop.xlane.xlu0 %568 }
 0x814   :  { %v575_v39 = vperm.slane %v569_v37, %v1748_v2 }
 0x815   :  { %v572_v38 = vpop.xlane.xlu1 %571 }
 0x816   :  { %v576_v40 = vperm.slane %v572_v38, %v1748_v2 }
 0x818   :  { %v577_v41 = vsel %vm311_vm10, %v576_v40, %v575_v39 }
 0x819   :  { %v579_v42 = vsel %vm204_vm13, %v577_v41, -inf }
 0x81a   :  { %580 = vmax.xlane.f32.xlu2 %v579_v42 }
 0x88d   :  { %v581_v43 = vpop.xlane.xlu2 %580 }
 0x88e   :  { %v583_v44 = vperm.slane %v581_v43, 0  ;;  %v584_v45 = vperm.slane %v581_v43, 1 }
 0x890   :  { %v587_v46 = vsub.f32 %v569_v37, %v583_v44  ;;  %v588_v47 = vsub.f32 %v572_v38, %v584_v45 }
 0x892   :  { %v589_v49 = vmul.f32 1.442695, %v587_v46  ;;  %v591_v50 = vmul.f32 1.442695, %v588_v47 }
 0x894   :  { %1448 = vpow2.f32 %v589_v49 }
 0x895   :  { %1450 = vpow2.f32 %v591_v50 }
 0x89a   :  { %v1449_v52 = vpop.eup %1448 }
 0x89b   :  { %v1451_v53 = vpop.eup %1450  ;;  %596 = vperm.xlu0 %1412, %v1449_v52  }
 0x89c   :  { %599 = vperm.xlu1 %1410, %v1451_v53  }
 0x90d   :  { %v597_v54 = vpop.permute.xlu0 %596 }
 0x90e   :  { %v600_v56 = vpop.permute.xlu1 %599  ;;  %v601_v57 = vperm.slane %v597_v54, %v1748_v2  ;;  %v111_v54 = vld [vmem:[%s1955_s1 + $0x8] sm:$0x3] }
 0x90f   :  { %v602_v59 = vperm.slane %v600_v56, %v1748_v2  ;;  %v112_v56 = vld [vmem:[%s1955_s1 + $0xa] sm:$0x3]  ;;  %132 = vst [vmem:[#allocation1 + $0x20] ss:$4 sm:$0xff] %v111_v54 }
 0x910   :  { %134 = vst [vmem:[#allocation1 + $0x21] ss:$4 sm:$0xff] %v112_v56 }
 0x911   :  { %v603_v60 = vsel %vm311_vm10, %v602_v59, %v601_v57 }
 0x912   :  { %v605_v61 = vsel %vm204_vm13, %v603_v60, 0.0 }
 0x913   :  { %606 = vadd.xlane.f32.xlu2 %v605_v61 }
 0x917   :  { %v136_v57 = vld.sshfl [vmem:[#allocation1 + $0x20] sm:$0xff pattern:$0x73625140] }
 0x918   :  { %145 = vst [vmem:[#allocation1 + $0x20] ss:$4 sm:$0xff] %v1673_v13  ;;  %1380 = vmatmul.msk.f32.gmra.mxu2 %vm52_vm0, %v136_v57 }
 0x919   :  { %147 = vst [vmem:[#allocation1 + $0x21] ss:$4 sm:$0xff] %v1673_v13 }
 0x920   :  { %v149_v60 = vld.sshfl [vmem:[#allocation1 + $0x20] sm:$0xff pattern:$0x73625140] }
 0x986   :  { %v607_v62 = vpop.xlane.xlu2 %606 }
 0x987   :  { %1452 = vrcp.f32 %v607_v62 }
 0x98d   :  { %v1453_v63 = vpop.eup %1452 }
 0x98e   :  { %v611_v0 = vperm.slane %v1453_v63, 1  ;;  %v610_v14 = vperm.slane %v1453_v63, 0 }
 0x990   :  { %v615_v1 = vmul.f32 %v1451_v53, %v611_v0  ;;  %v614_v3 = vmul.f32 %v1449_v52, %v610_v14 }
 0x992   :  { %622 = vperm.xlu0 %1412, %v615_v1   ;;  %619 = vperm.xlu2 %1411, %v614_v3  }
 0x99b   :  { %v176_v61 = vpop.f32.mrf.mxu2 }
 0x99c   :  { %v177_v62 = vadd.f32 %v176_v61, %v149_v60 }
 0x99e   :  { %v184_v63 = vrot.slane %v177_v62, 2  ;;  %193 = vst [vmem:[#allocation2 + $0x8] sm:$0x3] %v177_v62 }
 0x9a0   :  { %194 = vst [vmem:[#allocation2 + $0xa] sm:$0x3] %v184_v63 }
 0x9ec   :  { %v620_v4 = vpop.permute.xlu2 %619 }
 0x9ed   :  { %v632_v5 = vmul.f32 %v620_v4, %v1681_v16  ;;  %v624_v8 = vperm.slane %v620_v4, %v1748_v2 }
 0x9ef   :  { %v634_v6 = vrot.slane %v632_v5, 4 }
 0x9f1   :  { %v635_v7 = vadd.f32 %v634_v6, %v632_v5 }
 0x9f3   :  { %v636_v9 = vrot.slane %v635_v7, 2 }
 0x9f5   :  { %v637_v17 = vadd.f32 %v636_v9, %v635_v7 }
 0x9f7   :  { %v638_v21 = vrot.slane %v637_v17, 1 }
 0x9f9   :  { %v639_v24 = vadd.f32 %v638_v21, %v637_v17 }
 0xa04   :  { %v623_v48 = vpop.permute.xlu0 %622 }
 0xa05   :  { %v625_v10 = vperm.slane %v623_v48, %v1748_v2  ;;  %v633_v11 = vmul.f32 %v623_v48, %v1685_v23 }
 0xa07   :  { %v626_v12 = vsel %vm311_vm10, %v625_v10, %v624_v8  ;;  %v640_v15 = vrot.slane %v633_v11, 4 }
 0xa08   :  { %629 = vst.msk [vmem:[#allocation6 + $0x4] sm:$0x3] %vm204_vm13, %v626_v12 }
 0xa09   :  { %v641_v19 = vadd.f32 %v640_v15, %v633_v11 }
 0xa0b   :  { %v642_v20 = vrot.slane %v641_v19, 2 }
 0xa0d   :  { %v643_v22 = vadd.f32 %v642_v20, %v641_v19 }
 0xa0f   :  { %v644_v30 = vrot.slane %v643_v22, 1 }
 0xa11   :  { %v645_v25 = vadd.f32 %v644_v30, %v643_v22 }
 0xa13   :  { %v648_v27 = vsel %vm311_vm10, %v645_v25, %v639_v24 }
 0xa14   :  { %v650_v28 = vadd.f32 %v648_v27, %v532_v26 }
 0xa16   :  { %v653_v31 = vadd.f32 %v652_v29, %v650_v28 }
 0xa18   :  { %1454 = vtanh.f32 %v653_v31  ;;  %v1388_v33 = vmul.f32 -1.442695, %v653_v31 }
 0xa1a   :  { %1456 = vpow2.f32 %v1388_v33 }
 0xa1e   :  { %v1455_v32 = vpop.eup %1454 }
 0xa1f   :  { %676 = vrot.lane.b32.xlu1 %v1455_v32, %s1557_s0 }
 0xa20   :  { %v1457_v34 = vpop.eup %1456 }
 0xa21   :  { %v657_v35 = vadd.f32 1.0, %v1457_v34 }
 0xa23   :  { %1458 = vrcp.f32 %v657_v35  ;;  %v669_v41 = vand.u32 2147483648, %v657_v35  ;;  %vm663_vm4 = vweird.f32 %v657_v35  ;;  %v667_v42 = vand.u32 2147483647, %v657_v35 }
 0xa25   :  { %v670_v44 = vor.u32 1.1754944e-38, %v669_v41  ;;  %vm668_vm6 = vcmp.eq.f32.partialorder %v667_v42, 8.507059e+37 }
 0xa29   :  { %v1459_v36 = vpop.eup %1458 }
 0xa2a   :  { %v659_v37 = vmul.f32 %v1459_v36, %v657_v35  ;;  %vm664_vm3 = vweird.f32 %v1459_v36 }
 0xa2b   :  { %vm665_vm5 = vmor %vm663_vm4, %vm664_vm3 }
 0xa2c   :  { %v660_v38 = vsub.f32 1.0, %v659_v37 }
 0xa2e   :  { %v661_v39 = vmul.f32 %v1459_v36, %v660_v38 }
 0xa30   :  { %v662_v40 = vadd.f32 %v1459_v36, %v661_v39 }
 0xa32   :  { %v666_v43 = vsel %vm665_vm5, %v1459_v36, %v662_v40 }
 0xa33   :  { %v671_v46 = vsel %vm668_vm6, %v670_v44, %v666_v43 }
 0xa34   :  { %v674_v49 = vmul.f32 %v671_v46, %v1769_v18 }
 0xa91   :  { %v677_v45 = vpop.permute.xlu1 %676 }
 0xa92   :  { %v679_v47 = vmul.f32 %v677_v45, %v671_v46 }
 0xa94   :  { %681 = vrot.lane.b32.xlu0 %v679_v47, %s1557_s0 }
 0xb06   :  { %v682_v50 = vpop.permute.xlu0 %681 }
 0xb07   :  { %v1801_v52 = vadd.f32 %v682_v50, %v674_v49 }
 0xb09   :  { %1460 = vtanh.f32 %v1801_v52 }
 0xb0f   :  { %v1461_v53 = vpop.eup %1460 }
 0xb10   :  { %687 = vrot.lane.b32.xlu1 %v1461_v53, %s1557_s0 }
 0xb82   :  { %v688_v18 = vpop.permute.xlu1 %687 }
 0xb83   :  { %v690_v59 = vmul.f32 %v688_v18, %v671_v46 }
 0xb85   :  { %692 = vrot.lane.b32.xlu0 %v690_v59, %s1559_s15 }
 0xbf7   :  { %v693_v0 = vpop.permute.xlu0 %692 }
 0xbf8   :  { %696 = vst.msk [vmem:[#allocation3 + $0x4] sm:$0x3] %vm316_vm11, %v693_v0  ;;  %1389 = vmatmul.msk.f32.vlgmr.msrb.gmra.mxu2 %vm318_vm12, %v693_v0  ;;  %1390 = vmatmul.msk.f32.vlgmr.msra.gmra.mxu3 %vm318_vm12, %v693_v0 }
 0xbff   :  { %v1251_v14 = vld [vmem:[#allocation3 + $0x4] sm:$0x3] }
 0xc00   :  { %1272 = vst [vmem:[#allocation1 + $0x2] ss:$4 sm:$0xff] %v1251_v14 }
 0xc7b   :  { %v736_v13 = vpop.f32.mrf.mxu3 }
 0xc7c   :  { %v740_v1 = vrot.slane %v736_v13, 1  ;;  %v741_v3 = vperm.slane %v736_v13, 0 }
 0xc7e   :  { %v742_v4 = vperm.slane %v740_v1, 0  ;;  %v745_v5 = vadd.f32 %v741_v3, %v1732_v51  ;;  %v716_v1 = vpop.f32.mrf.mxu2 }
 0xc80   :  { %v746_v6 = vadd.f32 %v742_v4, %v1735_v55  ;;  %v747_v7 = vmax.f32 %v745_v5, 0.0  ;;  %v836_v5 = vld [vmem:[#allocation2 + $0x6] sm:$0x3] }
 0xc82   :  { %v749_v48 = vmul.f32 %v1741_v58, %v747_v7  ;;  %v748_v8 = vmax.f32 %v746_v6, 0.0 }
 0xc84   :  { %v751_v9 = vsel %vm52_vm0, %v749_v48, 0.0  ;;  %v750_v10 = vmul.f32 %v1741_v58, %v748_v8 }
 0xc85   :  { %752 = vadd.xlane.f32.xlu2 %v751_v9 }
 0xc86   :  { %v754_v11 = vsel %vm52_vm0, %v750_v10, 0.0 }
 0xc87   :  { %755 = vadd.xlane.f32.xlu1 %v754_v11 }
 0xcf8   :  { %v753_v12 = vpop.xlane.xlu2 %752 }
 0xcf9   :  { %v759_v17 = vperm.slane %v753_v12, %v1748_v2 }
 0xcfa   :  { %v756_v15 = vpop.xlane.xlu1 %755 }
 0xcfb   :  { %v760_v19 = vperm.slane %v756_v15, %v1748_v2 }
 0xcfd   :  { %v761_v20 = vsel %vm311_vm10, %v760_v19, %v759_v17 }
 0xcfe   :  { %v763_v21 = vsel %vm204_vm13, %v761_v20, -inf }
 0xcff   :  { %764 = vmax.xlane.f32.xlu0 %v763_v21 }
 0xd72   :  { %v765_v22 = vpop.xlane.xlu0 %764 }
 0xd73   :  { %v767_v30 = vperm.slane %v765_v22, 0  ;;  %v768_v24 = vperm.slane %v765_v22, 1 }
 0xd75   :  { %v771_v25 = vsub.f32 %v753_v12, %v767_v30  ;;  %v772_v26 = vsub.f32 %v756_v15, %v768_v24 }
 0xd77   :  { %v773_v27 = vmul.f32 1.442695, %v771_v25  ;;  %v775_v28 = vmul.f32 1.442695, %v772_v26 }
 0xd79   :  { %1462 = vpow2.f32 %v773_v27 }
 0xd7a   :  { %1464 = vpow2.f32 %v775_v28 }
 0xd7f   :  { %v1463_v29 = vpop.eup %1462 }
 0xd80   :  { %v1465_v31 = vpop.eup %1464  ;;  %780 = vperm.xlu2 %1411, %v1463_v29  }
 0xd81   :  { %783 = vperm.xlu1 %1410, %v1465_v31  }
 0xdda   :  { %v781_v32 = vpop.permute.xlu2 %780 }
 0xddb   :  { %v785_v34 = vperm.slane %v781_v32, %v1748_v2 }
 0xdf3   :  { %v784_v33 = vpop.permute.xlu1 %783 }
 0xdf4   :  { %v786_v35 = vperm.slane %v784_v33, %v1748_v2  ;;  %v1258_v33 = vld [vmem:[%s1963_s9 + $0x18] sm:$0xff] }
 0xdf5   :  { %1312 = vmatpush.msrb.mxu0 %v1258_v33 }
 0xdf6   :  { %v787_v36 = vsel %vm311_vm10, %v786_v35, %v785_v34  ;;  %v1256_v34 = vld [vmem:[%s1963_s9 + $0x8] sm:$0xff]  ;;  %v1255_v35 = vld [vmem:[%s1963_s9] sm:$0xff] }
 0xdf7   :  { %v789_v37 = vsel %vm204_vm13, %v787_v36, 0.0 }
 0xdf8   :  { %790 = vadd.xlane.f32.xlu0 %v789_v37 }
 0xe6b   :  { %v791_v38 = vpop.xlane.xlu0 %790 }
 0xe6c   :  { %1466 = vrcp.f32 %v791_v38  ;;  %v1865_v38 = vld [vmem:[%s1964_s10] ss:$0 sm:$0xff] }
 0xe72   :  { %v1467_v39 = vpop.eup %1466 }
 0xe73   :  { %v795_v40 = vperm.slane %v1467_v39, 1  ;;  %v794_v41 = vperm.slane %v1467_v39, 0 }
 0xe75   :  { %v799_v42 = vmul.f32 %v1465_v31, %v795_v40  ;;  %v798_v43 = vmul.f32 %v1463_v29, %v794_v41 }
 0xe77   :  { %806 = vperm.xlu2 %1411, %v799_v42   ;;  %803 = vperm.xlu0 %1412, %v798_v43  }
 0xed1   :  { %v807_v44 = vpop.permute.xlu2 %806 }
 0xed2   :  { %v817_v45 = vmul.f32 %v807_v44, %v1685_v23  ;;  %v809_v50 = vperm.slane %v807_v44, %v1748_v2 }
 0xed4   :  { %v824_v46 = vrot.slane %v817_v45, 4 }
 0xed6   :  { %v825_v47 = vadd.f32 %v824_v46, %v817_v45 }
 0xed8   :  { %v826_v53 = vrot.slane %v825_v47, 2 }
 0xeda   :  { %v827_v59 = vadd.f32 %v826_v53, %v825_v47 }
 0xedc   :  { %v828_v62 = vrot.slane %v827_v59, 1 }
 0xede   :  { %v829_v14 = vadd.f32 %v828_v62, %v827_v59 }
 0xee9   :  { %v804_v49 = vpop.permute.xlu0 %803 }
 0xeea   :  { %v808_v54 = vperm.slane %v804_v49, %v1748_v2  ;;  %v816_v56 = vmul.f32 %v804_v49, %v1681_v16 }
 0xeec   :  { %v810_v57 = vsel %vm311_vm10, %v809_v50, %v808_v54  ;;  %v818_v18 = vrot.slane %v816_v56, 4 }
 0xeed   :  { %813 = vst.msk [vmem:[#allocation6 + $0x6] sm:$0x3] %vm204_vm13, %v810_v57 }
 0xeee   :  { %v819_v60 = vadd.f32 %v818_v18, %v816_v56 }
 0xef0   :  { %v820_v61 = vrot.slane %v819_v60, 2 }
 0xef2   :  { %v821_v63 = vadd.f32 %v820_v61, %v819_v60 }
 0xef4   :  { %v822_v0 = vrot.slane %v821_v63, 1 }
 0xef6   :  { %v823_v13 = vadd.f32 %v822_v0, %v821_v63 }
 0xef8   :  { %v832_v3 = vsel %vm311_vm10, %v829_v14, %v823_v13 }
 0xef9   :  { %v834_v4 = vadd.f32 %v832_v3, %v716_v1 }
 0xefb   :  { %v837_v6 = vadd.f32 %v836_v5, %v834_v4 }
 0xefd   :  { %1468 = vtanh.f32 %v837_v6  ;;  %v1391_v48 = vmul.f32 -1.442695, %v837_v6 }
 0xeff   :  { %1470 = vpow2.f32 %v1391_v48 }
 0xf03   :  { %v1469_v7 = vpop.eup %1468 }
 0xf04   :  { %860 = vrot.lane.b32.xlu1 %v1469_v7, %s1557_s0 }
 0xf05   :  { %v1471_v8 = vpop.eup %1470 }
 0xf06   :  { %v841_v9 = vadd.f32 1.0, %v1471_v8 }
 0xf08   :  { %1472 = vrcp.f32 %v841_v9  ;;  %v853_v19 = vand.u32 2147483648, %v841_v9  ;;  %vm847_vm8 = vweird.f32 %v841_v9  ;;  %v851_v20 = vand.u32 2147483647, %v841_v9 }
 0xf0a   :  { %v854_v22 = vor.u32 1.1754944e-38, %v853_v19  ;;  %vm852_vm14 = vcmp.eq.f32.partialorder %v851_v20, 8.507059e+37 }
 0xf0e   :  { %v1473_v10 = vpop.eup %1472 }
 0xf0f   :  { %v843_v11 = vmul.f32 %v1473_v10, %v841_v9  ;;  %vm848_vm7 = vweird.f32 %v1473_v10 }
 0xf10   :  { %vm849_vm9 = vmor %vm847_vm8, %vm848_vm7 }
 0xf11   :  { %v844_v12 = vsub.f32 1.0, %v843_v11 }
 0xf13   :  { %v845_v15 = vmul.f32 %v1473_v10, %v844_v12 }
 0xf15   :  { %v846_v17 = vadd.f32 %v1473_v10, %v845_v15 }
 0xf17   :  { %v850_v21 = vsel %vm849_vm9, %v1473_v10, %v846_v17 }
 0xf18   :  { %v855_v24 = vsel %vm852_vm14, %v854_v22, %v850_v21 }
 0xf19   :  { %v858_v26 = vmul.f32 %v855_v24, %v1801_v52  ;;  %v1257_v52 = vld [vmem:[%s1963_s9 + $0x10] sm:$0xff]  ;;  %s1560_s9 = smov [#allocation6]  }
 0xf1a   :  { %1313 = vmatpush.msrb.mxu0 %v1257_v52  ;;  %s1356_s10 = sshll.u32 %s1560_s9, 4  ;;  %s1357_s10 = int_to_ptr.vmem [resolvable:$true] %s1356_s10 }
 0xf1c   :  { %1314 = vmatpush.msrb.mxu0 %v1256_v34 }
 0xf1e   :  { %1315 = vmatpush.msrb.mxu0 %v1255_v35 }
 0xf76   :  { %v861_v30 = vpop.permute.xlu1 %860 }
 0xf77   :  { %v863_v25 = vmul.f32 %v861_v30, %v855_v24 }
 0xf79   :  { %865 = vrot.lane.b32.xlu2 %v863_v25, %s1557_s0 }
 0xfd3   :  { %v866_v27 = vpop.permute.xlu2 %865 }
 0xfd4   :  { %v1842_v28 = vadd.f32 %v866_v27, %v858_v26 }
 0xfd6   :  { %1474 = vtanh.f32 %v1842_v28 }
 0xfdc   :  { %v1475_v29 = vpop.eup %1474 }
 0xfdd   :  { %871 = vrot.lane.b32.xlu0 %v1475_v29, %s1557_s0 }
0x104f   :  { %v872_v31 = vpop.permute.xlu0 %871 }
0x1050   :  { %v874_v32 = vmul.f32 %v872_v31, %v855_v24 }
0x1052   :  { %876 = vrot.lane.b32.xlu1 %v874_v32, %s1559_s15 }
0x10c4   :  { %v877_v36 = vpop.permute.xlu1 %876 }
0x10c5   :  { %880 = vst.msk [vmem:[#allocation3 + $0x6] sm:$0x3] %vm316_vm11, %v877_v36  ;;  %1392 = vmatmul.msk.f32.vlgmr.msra.gmra.mxu0 %vm318_vm12, %v877_v36  ;;  %1393 = vmatmul.msk.f32.vlgmr.msrb.gmra.mxu1 %vm318_vm12, %v877_v36 }
0x10cc   :  { %v1252_v37 = vld [vmem:[#allocation3 + $0x6] sm:$0x3] }
0x10cd   :  { %1274 = vst [vmem:[#allocation1 + $0x3] ss:$4 sm:$0xff] %v1252_v37 }
0x10d4   :  { %v1279_v39 = vld.sshfl [vmem:[#allocation1] sm:$0xff pattern:$0x73625140] }
0x10d5   :  { %1281 = vst [vmem:[#allocation1] ss:$4 sm:$0xff] %v1865_v38  ;;  %1398 = vmatmul.msk.f32.vlgmr.msrb.gmra.mxu0 %vm318_vm12, %v1279_v39 }
0x10d6   :  { %1283 = vst [vmem:[#allocation1 + $0x1] ss:$4 sm:$0xff] %v1865_v38 }
0x10d7   :  { %1285 = vst [vmem:[#allocation1 + $0x2] ss:$4 sm:$0xff] %v1865_v38 }
0x10d8   :  { %1287 = vst [vmem:[#allocation1 + $0x3] ss:$4 sm:$0xff] %v1865_v38 }
0x10df   :  { %v1292_v57 = vld.sshfl [vmem:[#allocation1] sm:$0xff pattern:$0x73625140] }
0x1142   :  { %v920_v40 = vpop.f32.mrf.mxu1  ;;  %v1875_v50 = vpop.f32.mrf.mxu0 }
0x1143   :  { %v924_v41 = vrot.slane %v920_v40, 1  ;;  %v925_v42 = vperm.slane %v920_v40, 0 }
0x1145   :  { %v926_v43 = vperm.slane %v924_v41, 0  ;;  %v929_v44 = vadd.f32 %v925_v42, %v1732_v51 }
0x1147   :  { %v930_v45 = vadd.f32 %v926_v43, %v1735_v55  ;;  %v931_v46 = vmax.f32 %v929_v44, 0.0 }
0x1149   :  { %v932_v47 = vmax.f32 %v930_v45, 0.0  ;;  %v933_v49 = vmul.f32 %v1741_v58, %v931_v46 }
0x114b   :  { %v935_v53 = vsel %vm52_vm0, %v933_v49, 0.0  ;;  %v934_v54 = vmul.f32 %v1741_v58, %v932_v47 }
0x114c   :  { %936 = vadd.xlane.f32.xlu2 %v935_v53 }
0x114d   :  { %v938_v56 = vsel %vm52_vm0, %v934_v54, 0.0 }
0x114e   :  { %939 = vadd.xlane.f32.xlu0 %v938_v56  ;;  %v1020_v56 = vld [vmem:[#allocation2 + $0x8] sm:$0x3] }
0x1152   :  { %v1317_v18 = vpop.f32.mrf.mxu0 }
0x1153   :  { %v1318_v59 = vadd.f32 %v1317_v18, %v1292_v57 }
0x1155   :  { %v1325_v60 = vrot.slane %v1318_v59, 2  ;;  %v1326_v61 = vrot.slane %v1318_v59, 4  ;;  %v1327_v62 = vrot.slane %v1318_v59, 6  ;;  %1333 = vst.msk [vmem:[#allocation4] sm:$0x3] %vm316_vm11, %v1318_v59 }
0x1157   :  { %1334 = vst.msk [vmem:[#allocation4 + $0x2] sm:$0x3] %vm316_vm11, %v1325_v60 }
0x1158   :  { %1335 = vst.msk [vmem:[#allocation4 + $0x4] sm:$0x3] %vm316_vm11, %v1326_v61 }
0x1159   :  { %1336 = vst.msk [vmem:[#allocation4 + $0x6] sm:$0x3] %vm316_vm11, %v1327_v62 }
0x11bf   :  { %v937_v63 = vpop.xlane.xlu2 %936 }
0x11c0   :  { %v943_v14 = vperm.slane %v937_v63, %v1748_v2 }
0x11c1   :  { %v940_v0 = vpop.xlane.xlu0 %939 }
0x11c2   :  { %v944_v13 = vperm.slane %v940_v0, %v1748_v2 }
0x11c4   :  { %v945_v1 = vsel %vm311_vm10, %v944_v13, %v943_v14 }
0x11c5   :  { %v947_v3 = vsel %vm204_vm13, %v945_v1, -inf }
0x11c6   :  { %948 = vmax.xlane.f32.xlu1 %v947_v3 }
0x1239   :  { %v949_v4 = vpop.xlane.xlu1 %948 }
0x123a   :  { %v951_v5 = vperm.slane %v949_v4, 0  ;;  %v952_v6 = vperm.slane %v949_v4, 1 }
0x123c   :  { %v955_v7 = vsub.f32 %v937_v63, %v951_v5  ;;  %v956_v48 = vsub.f32 %v940_v0, %v952_v6 }
0x123e   :  { %v957_v8 = vmul.f32 1.442695, %v955_v7  ;;  %v959_v9 = vmul.f32 1.442695, %v956_v48 }
0x1240   :  { %1476 = vpow2.f32 %v957_v8 }
0x1241   :  { %1478 = vpow2.f32 %v959_v9 }
0x1246   :  { %v1477_v10 = vpop.eup %1476 }
0x1247   :  { %v1479_v11 = vpop.eup %1478  ;;  %964 = vperm.xlu2 %1411, %v1477_v10  }
0x1248   :  { %967 = vperm.xlu0 %1412, %v1479_v11  }
0x12a1   :  { %v965_v12 = vpop.permute.xlu2 %964 }
0x12a2   :  { %v969_v17 = vperm.slane %v965_v12, %v1748_v2 }
0x12ba   :  { %v968_v15 = vpop.permute.xlu0 %967 }
0x12bb   :  { %v970_v19 = vperm.slane %v968_v15, %v1748_v2 }
0x12bd   :  { %v971_v20 = vsel %vm311_vm10, %v970_v19, %v969_v17 }
0x12be   :  { %v973_v21 = vsel %vm204_vm13, %v971_v20, 0.0 }
0x12bf   :  { %974 = vadd.xlane.f32.xlu1 %v973_v21 }
0x1332   :  { %v975_v22 = vpop.xlane.xlu1 %974 }
0x1333   :  { %1480 = vrcp.f32 %v975_v22 }
0x1339   :  { %v1481_v30 = vpop.eup %1480 }
0x133a   :  { %v979_v24 = vperm.slane %v1481_v30, 1  ;;  %v978_v25 = vperm.slane %v1481_v30, 0 }
0x133c   :  { %v983_v26 = vmul.f32 %v1479_v11, %v979_v24  ;;  %v982_v27 = vmul.f32 %v1477_v10, %v978_v25 }
0x133e   :  { %990 = vperm.xlu0 %1412, %v983_v26   ;;  %987 = vperm.xlu1 %1410, %v982_v27  }
0x13b0   :  { %v991_v29 = vpop.permute.xlu0 %990  ;;  %v988_v31 = vpop.permute.xlu1 %987 }
0x13b1   :  { %v993_v32 = vperm.slane %v991_v29, %v1748_v2  ;;  %v1001_v33 = vmul.f32 %v991_v29, %v1685_v23  ;;  %v992_v52 = vperm.slane %v988_v31, %v1748_v2  ;;  %v1000_v34 = vmul.f32 %v988_v31, %v1681_v16 }
0x13b3   :  { %v1008_v35 = vrot.slane %v1001_v33, 4  ;;  %v994_v36 = vsel %vm311_vm10, %v993_v32, %v992_v52  ;;  %v1002_v37 = vrot.slane %v1000_v34, 4 }
0x13b4   :  { %997 = vst.msk [vmem:[#allocation6 + $0x8] sm:$0x3] %vm204_vm13, %v994_v36 }
0x13b5   :  { %v1009_v39 = vadd.f32 %v1008_v35, %v1001_v33  ;;  %v1003_v40 = vadd.f32 %v1002_v37, %v1000_v34 }
0x13b7   :  { %v1010_v41 = vrot.slane %v1009_v39, 2  ;;  %v1004_v42 = vrot.slane %v1003_v40, 2 }
0x13b9   :  { %v1011_v43 = vadd.f32 %v1010_v41, %v1009_v39  ;;  %v1005_v44 = vadd.f32 %v1004_v42, %v1003_v40 }
0x13bb   :  { %v1012_v45 = vrot.slane %v1011_v43, 1  ;;  %v1006_v46 = vrot.slane %v1005_v44, 1 }
0x13bd   :  { %v1013_v47 = vadd.f32 %v1012_v45, %v1011_v43  ;;  %v1007_v49 = vadd.f32 %v1006_v46, %v1005_v44 }
0x13bf   :  { %v1016_v53 = vsel %vm311_vm10, %v1013_v47, %v1007_v49 }
0x13c0   :  { %v1018_v54 = vadd.f32 %v1016_v53, %v1875_v50 }
0x13c2   :  { %v1021_v57 = vadd.f32 %v1020_v56, %v1018_v54 }
0x13c4   :  { %1482 = vtanh.f32 %v1021_v57  ;;  %v1394_v59 = vmul.f32 -1.442695, %v1021_v57 }
0x13c6   :  { %1484 = vpow2.f32 %v1394_v59 }
0x13ca   :  { %v1483_v18 = vpop.eup %1482 }
0x13cb   :  { %1044 = vrot.lane.b32.xlu2 %v1483_v18, %s1557_s0 }
0x13cc   :  { %v1485_v60 = vpop.eup %1484 }
0x13cd   :  { %v1025_v61 = vadd.f32 1.0, %v1485_v60 }
0x13cf   :  { %1486 = vrcp.f32 %v1025_v61  ;;  %v1037_v1 = vand.u32 2147483648, %v1025_v61  ;;  %vm1031_vm1 = vweird.f32 %v1025_v61  ;;  %v1035_v50 = vand.u32 2147483647, %v1025_v61 }
0x13d1   :  { %v1038_v4 = vor.u32 1.1754944e-38, %v1037_v1  ;;  %vm1036_vm3 = vcmp.eq.f32.partialorder %v1035_v50, 8.507059e+37 }
0x13d5   :  { %v1487_v62 = vpop.eup %1486 }
0x13d6   :  { %v1027_v63 = vmul.f32 %v1487_v62, %v1025_v61  ;;  %vm1032_vm15 = vweird.f32 %v1487_v62 }
0x13d7   :  { %vm1033_vm2 = vmor %vm1031_vm1, %vm1032_vm15 }
0x13d8   :  { %v1028_v0 = vsub.f32 1.0, %v1027_v63 }
0x13da   :  { %v1029_v14 = vmul.f32 %v1487_v62, %v1028_v0 }
0x13dc   :  { %v1030_v13 = vadd.f32 %v1487_v62, %v1029_v14 }
0x13de   :  { %v1034_v3 = vsel %vm1033_vm2, %v1487_v62, %v1030_v13 }
0x13df   :  { %v1039_v6 = vsel %vm1036_vm3, %v1038_v4, %v1034_v3 }
0x13e0   :  { %v1042_v48 = vmul.f32 %v1039_v6, %v1842_v28 }
0x1425   :  { %v1045_v5 = vpop.permute.xlu2 %1044 }
0x1426   :  { %v1047_v7 = vmul.f32 %v1045_v5, %v1039_v6 }
0x1428   :  { %1049 = vrot.lane.b32.xlu0 %v1047_v7, %s1557_s0 }
0x149a   :  { %v1050_v8 = vpop.permute.xlu0 %1049 }
0x149b   :  { %v1903_v9 = vadd.f32 %v1050_v8, %v1042_v48 }
0x149d   :  { %1488 = vtanh.f32 %v1903_v9 }
0x14a3   :  { %v1489_v10 = vpop.eup %1488 }
0x14a4   :  { %1055 = vrot.lane.b32.xlu2 %v1489_v10, %s1557_s0 }
0x14fe   :  { %v1056_v11 = vpop.permute.xlu2 %1055 }
0x14ff   :  { %v1058_v12 = vmul.f32 %v1056_v11, %v1039_v6 }
0x1501   :  { %1060 = vrot.lane.b32.xlu0 %v1058_v12, %s1559_s15 }
0x1573   :  { %v1061_v15 = vpop.permute.xlu0 %1060 }
0x1574   :  { %1064 = vst.msk [vmem:[#allocation3 + $0x8] sm:$0x3] %vm316_vm11, %v1061_v15  ;;  %1395 = vmatmul.msk.f32.vlgmr.msra.gmra.mxu2 %vm318_vm12, %v1061_v15  ;;  %1396 = vmatmul.msk.f32.vlgmr.msrb.gmra.mxu3 %vm318_vm12, %v1061_v15 }
0x157b   :  { %v1253_v28 = vld [vmem:[#allocation3 + $0x8] sm:$0x3] }
0x157c   :  { %1276 = vst [vmem:[#allocation1 + $0x20] ss:$4 sm:$0xff] %v1253_v28 }
0x15f7   :  { %v1104_v17 = vpop.f32.mrf.mxu3  ;;  %v1084_v15 = vpop.f32.mrf.mxu2 }
0x15f8   :  { %v1108_v19 = vrot.slane %v1104_v17, 1  ;;  %v1109_v20 = vperm.slane %v1104_v17, 0 }
0x15fa   :  { %v1110_v21 = vperm.slane %v1108_v19, 0  ;;  %v1113_v22 = vadd.f32 %v1109_v20, %v1732_v51 }
0x15fc   :  { %v1114_v30 = vadd.f32 %v1110_v21, %v1735_v55  ;;  %v1115_v24 = vmax.f32 %v1113_v22, 0.0 }
0x15fe   :  { %v1116_v25 = vmax.f32 %v1114_v30, 0.0  ;;  %v1117_v26 = vmul.f32 %v1741_v58, %v1115_v24 }
0x1600   :  { %v1119_v27 = vsel %vm52_vm0, %v1117_v26, 0.0  ;;  %v1118_v29 = vmul.f32 %v1741_v58, %v1116_v25 }
0x1601   :  { %1120 = vadd.xlane.f32.xlu1 %v1119_v27 }
0x1602   :  { %v1122_v31 = vsel %vm52_vm0, %v1118_v29, 0.0 }
0x1603   :  { %1123 = vadd.xlane.f32.xlu2 %v1122_v31 }
0x1674   :  { %v1121_v32 = vpop.xlane.xlu1 %1120 }
0x1675   :  { %v1127_v52 = vperm.slane %v1121_v32, %v1748_v2 }
0x1676   :  { %v1124_v33 = vpop.xlane.xlu2 %1123 }
0x1677   :  { %v1128_v51 = vperm.slane %v1124_v33, %v1748_v2 }
0x1679   :  { %v1129_v55 = vsel %vm311_vm10, %v1128_v51, %v1127_v52 }
0x167a   :  { %v1131_v34 = vsel %vm204_vm13, %v1129_v55, -inf }
0x167b   :  { %1132 = vmax.xlane.f32.xlu0 %v1131_v34 }
0x16ee   :  { %v1133_v35 = vpop.xlane.xlu0 %1132 }
0x16ef   :  { %v1135_v36 = vperm.slane %v1133_v35, 0  ;;  %v1136_v37 = vperm.slane %v1133_v35, 1 }
0x16f1   :  { %v1139_v39 = vsub.f32 %v1121_v32, %v1135_v36  ;;  %v1140_v58 = vsub.f32 %v1124_v33, %v1136_v37 }
0x16f3   :  { %v1141_v40 = vmul.f32 1.442695, %v1139_v39  ;;  %v1143_v41 = vmul.f32 1.442695, %v1140_v58 }
0x16f5   :  { %1490 = vpow2.f32 %v1141_v40 }
0x16f6   :  { %1492 = vpow2.f32 %v1143_v41 }
0x16fb   :  { %v1491_v42 = vpop.eup %1490 }
0x16fc   :  { %v1493_v43 = vpop.eup %1492  ;;  %1148 = vperm.xlu2 %1411, %v1491_v42  }
0x16fd   :  { %1151 = vperm.xlu1 %1410, %v1493_v43  }
0x1756   :  { %v1149_v44 = vpop.permute.xlu2 %1148 }
0x1757   :  { %v1153_v46 = vperm.slane %v1149_v44, %v1748_v2 }
0x176f   :  { %v1152_v45 = vpop.permute.xlu1 %1151 }
0x1770   :  { %v1154_v47 = vperm.slane %v1152_v45, %v1748_v2 }
0x1772   :  { %v1155_v49 = vsel %vm311_vm10, %v1154_v47, %v1153_v46 }
0x1773   :  { %v1157_v53 = vsel %vm204_vm13, %v1155_v49, 0.0 }
0x1774   :  { %1158 = vadd.xlane.f32.xlu0 %v1157_v53 }
0x17e7   :  { %v1159_v54 = vpop.xlane.xlu0 %1158 }
0x17e8   :  { %1494 = vrcp.f32 %v1159_v54 }
0x17ee   :  { %v1495_v56 = vpop.eup %1494 }
0x17ef   :  { %v1163_v57 = vperm.slane %v1495_v56, 1  ;;  %v1162_v18 = vperm.slane %v1495_v56, 0 }
0x17f1   :  { %v1167_v59 = vmul.f32 %v1493_v43, %v1163_v57  ;;  %v1166_v60 = vmul.f32 %v1491_v42, %v1162_v18 }
0x17f3   :  { %1174 = vperm.xlu2 %1411, %v1167_v59   ;;  %1171 = vperm.xlu0 %1412, %v1166_v60  }
0x184d   :  { %v1175_v61 = vpop.permute.xlu2 %1174 }
0x184e   :  { %v1185_v62 = vmul.f32 %v1175_v61, %v1685_v23  ;;  %v1177_v13 = vperm.slane %v1175_v61, %v1748_v2 }
0x1850   :  { %v1192_v63 = vrot.slane %v1185_v62, 4 }
0x1852   :  { %v1193_v0 = vadd.f32 %v1192_v63, %v1185_v62 }
0x1854   :  { %v1194_v1 = vrot.slane %v1193_v0, 2 }
0x1856   :  { %v1195_v6 = vadd.f32 %v1194_v1, %v1193_v0 }
0x1858   :  { %v1196_v8 = vrot.slane %v1195_v6, 1 }
0x185a   :  { %v1197_v11 = vadd.f32 %v1196_v8, %v1195_v6 }
0x1865   :  { %v1172_v14 = vpop.permute.xlu0 %1171 }
0x1866   :  { %v1176_v50 = vperm.slane %v1172_v14, %v1748_v2  ;;  %v1184_v3 = vmul.f32 %v1172_v14, %v1681_v16  ;;  %v1204_v2 = vld [vmem:[#allocation2 + $0xa] sm:$0x3] }
0x1868   :  { %v1178_v4 = vsel %vm311_vm10, %v1177_v13, %v1176_v50  ;;  %v1186_v5 = vrot.slane %v1184_v3, 4 }
0x1869   :  { %1181 = vst.msk [vmem:[#allocation6 + $0xa] sm:$0x3] %vm204_vm13, %v1178_v4 }
0x186a   :  { %v1187_v7 = vadd.f32 %v1186_v5, %v1184_v3 }
0x186c   :  { %v1188_v48 = vrot.slane %v1187_v7, 2 }
0x186e   :  { %v1189_v23 = vadd.f32 %v1188_v48, %v1187_v7 }
0x1870   :  { %v1190_v10 = vrot.slane %v1189_v23, 1 }
0x1872   :  { %v1191_v12 = vadd.f32 %v1190_v10, %v1189_v23 }
0x1874   :  { %v1200_v28 = vsel %vm311_vm10, %v1197_v11, %v1191_v12 }
0x1875   :  { %v1202_v17 = vadd.f32 %v1200_v28, %v1084_v15 }
0x1877   :  { %v1205_v19 = vadd.f32 %v1204_v2, %v1202_v17 }
0x1879   :  { %1496 = vtanh.f32 %v1205_v19  ;;  %v1397_v20 = vmul.f32 -1.442695, %v1205_v19 }
0x187b   :  { %1498 = vpow2.f32 %v1397_v20 }
0x187f   :  { %v1497_v16 = vpop.eup %1496 }
0x1880   :  { %1228 = vrot.lane.b32.xlu1 %v1497_v16, %s1557_s0 }
0x1881   :  { %v1499_v21 = vpop.eup %1498 }
0x1882   :  { %v1209_v22 = vadd.f32 1.0, %v1499_v21 }
0x1884   :  { %1500 = vrcp.f32 %v1209_v22  ;;  %v1221_v29 = vand.u32 2147483648, %v1209_v22  ;;  %vm1215_vm10 = vweird.f32 %v1209_v22  ;;  %v1219_v31 = vand.u32 2147483647, %v1209_v22 }
0x1886   :  { %v1222_v33 = vor.u32 1.1754944e-38, %v1221_v29  ;;  %vm1220_vm5 = vcmp.eq.f32.partialorder %v1219_v31, 8.507059e+37 }
0x188a   :  { %v1501_v30 = vpop.eup %1500 }
0x188b   :  { %v1211_v24 = vmul.f32 %v1501_v30, %v1209_v22  ;;  %vm1216_vm0 = vweird.f32 %v1501_v30 }
0x188c   :  { %vm1217_vm4 = vmor %vm1215_vm10, %vm1216_vm0 }
0x188d   :  { %v1212_v25 = vsub.f32 1.0, %v1211_v24 }
0x188f   :  { %v1213_v26 = vmul.f32 %v1501_v30, %v1212_v25 }
0x1891   :  { %v1214_v27 = vadd.f32 %v1501_v30, %v1213_v26 }
0x1893   :  { %v1218_v32 = vsel %vm1217_vm4, %v1501_v30, %v1214_v27 }
0x1894   :  { %v1223_v51 = vsel %vm1220_vm5, %v1222_v33, %v1218_v32 }
0x1895   :  { %v1226_v34 = vmul.f32 %v1223_v51, %v1903_v9  ;;  %v1561_v9 = vmov 0.0  }
0x1896   :  { %205 = vst.msk [vmem:[#allocation6] sm:$0x3] %vm204_vm13, %v1561_v9 }
0x18f2   :  { %v1229_v52 = vpop.permute.xlu1 %1228 }
0x18f3   :  { %v1231_v55 = vmul.f32 %v1229_v52, %v1223_v51 }
0x18f5   :  { %1233 = vrot.lane.b32.xlu2 %v1231_v55, %s1557_s0 }
0x194f   :  { %v1234_v35 = vpop.permute.xlu2 %1233 }
0x1950   :  { %v1236_v36 = vadd.f32 %v1234_v35, %v1226_v34 }
0x1952   :  { %1502 = vtanh.f32 %v1236_v36 }
0x1958   :  { %v1503_v37 = vpop.eup %1502 }
0x1959   :  { %1239 = vrot.lane.b32.xlu1 %v1503_v37, %s1557_s0 }
0x19cb   :  { %v1240_v39 = vpop.permute.xlu1 %1239 }
0x19cc   :  { %v1242_v58 = vmul.f32 %v1240_v39, %v1223_v51 }
0x19ce   :  { %1244 = vrot.lane.b32.xlu0 %v1242_v58, %s1559_s15  ;;  %s1562_s15 = smov 2  }
0x19cf   :  { %1364 = dma.vmem_to_hbm [thread:$0]  %s1357_s10, 192, %s1359_s17, [#allocation7], %s1557_s0, %s1557_s0, %s1562_s15  }
0x1a40   :  { %v1245_v40 = vpop.permute.xlu0 %1244 }
0x1a41   :  { %1248 = vst.msk [vmem:[#allocation3 + $0xa] sm:$0x3] %vm316_vm11, %v1245_v40 }
0x1a48   :  { %v1254_v41 = vld [vmem:[#allocation3 + $0xa] sm:$0x3] }
0x1a49   :  { %1278 = vst [vmem:[#allocation1 + $0x21] ss:$4 sm:$0xff] %v1254_v41 }
0x1a50   :  { %v1280_v42 = vld.sshfl [vmem:[#allocation1 + $0x20] sm:$0xff pattern:$0x73625140] }
0x1a51   :  { %1289 = vst [vmem:[#allocation1 + $0x20] ss:$4 sm:$0xff] %v1865_v38  ;;  %1399 = vmatmul.msk.f32.gmra.mxu0 %vm318_vm12, %v1280_v42 }
0x1a52   :  { %1291 = vst [vmem:[#allocation1 + $0x21] ss:$4 sm:$0xff] %v1865_v38 }
0x1a59   :  { %v1293_v43 = vld.sshfl [vmem:[#allocation1 + $0x20] sm:$0xff pattern:$0x73625140] }
0x1ace   :  { %v1320_v44 = vpop.f32.mrf.mxu0 }
0x1acf   :  { %v1321_v38 = vadd.f32 %v1320_v44, %v1293_v43 }
0x1ad1   :  { %v1328_v45 = vrot.slane %v1321_v38, 2  ;;  %1337 = vst.msk [vmem:[#allocation4 + $0x8] sm:$0x3] %vm316_vm11, %v1321_v38 }
0x1ad3   :  { %1338 = vst.msk [vmem:[#allocation4 + $0xa] sm:$0x3] %vm316_vm11, %v1328_v45 }
0x1ad4   :  { %1351 = dma.vmem_to_hbm [thread:$0]  %s1344_s19, 192, %s1346_s7, [#allocation5], %s1557_s0, %s1557_s0, %s1562_s15  }
0x1ad5   :  { %1552 = dma.done.wait [#allocation5], 192  }
0x1ad6   :  { %1553 = vsyncadd [#allocation5], 4294967104 }
0x1ad7   :  { %1554 = dma.done.wait [#allocation7], 192  }
0x1ad8   :  { %1555 = vsyncadd [#allocation7], 4294967104 }
0x1ad9   :  { %1373 = vsyncpa [#allocation5], 1 }
0x1ada   :  { %1374 = vsyncpa [#allocation7], 1 }

</bundles_post_ra>
